<compile_context>
chip_gen: v5e
topology: v5e:2x2
jax: 0.10.0
libtpu: 0.0.40
codegen_flags: <defaults>
</compile_context>

<pallas_src>
import functools

import jax
import jax.numpy as jnp
import numpy as np
from jax.experimental import pallas as pl
from jax.experimental.pallas import tpu as pltpu

# Explicit scoped-VMEM budget (v5e's default scoped limit is only 16 MiB even
# though physical VMEM is 128 MiB; 64 MiB also fits v7x's 64 MiB VMEM).
_VMEM_LIMIT_BYTES = 64 * 1024 * 1024


# --------------------------------------------------------------------------
# Tiled matmul-with-bias kernel (time-parallel input / output projections).
# --------------------------------------------------------------------------
def _matmul_bias_kernel(a_ref, b_ref, bias_ref, o_ref, acc_ref):
    k = pl.program_id(2)

    @pl.when(k == 0)
    def _():
        acc_ref[...] = jnp.zeros_like(acc_ref)

    acc_ref[...] += jnp.dot(a_ref[...], b_ref[...],
                            preferred_element_type=jnp.float32)

    @pl.when(k == pl.num_programs(2) - 1)
    def _():
        o_ref[...] = (acc_ref[...] + bias_ref[...]).astype(o_ref.dtype)


def _pick_tile(dim, candidates):
    for c in candidates:
        if dim % c == 0:
            return c
    return dim  # fall back to the full (unblocked) dimension


def _matmul_bias(a, b, bias):
    """a: [M, K], b: [K, N], bias: [1, N] -> [M, N] float32, MXU-tiled."""
    M, K = a.shape
    _, N = b.shape
    tm = _pick_tile(M, (512, 256, 128))
    tk = _pick_tile(K, (512, 256, 128))
    tn = _pick_tile(N, (512, 256, 128))
    grid = (M // tm, N // tn, K // tk)
    return pl.pallas_call(
        _matmul_bias_kernel,
        out_shape=jax.ShapeDtypeStruct((M, N), jnp.float32),
        grid_spec=pltpu.PrefetchScalarGridSpec(
            num_scalar_prefetch=0,
            grid=grid,
            in_specs=[
                pl.BlockSpec((tm, tk), lambda i, j, k: (i, k)),
                pl.BlockSpec((tk, tn), lambda i, j, k: (k, j)),
                pl.BlockSpec((1, tn), lambda i, j, k: (0, j)),
            ],
            out_specs=pl.BlockSpec((tm, tn), lambda i, j, k: (i, j)),
            scratch_shapes=[pltpu.VMEM((tm, tn), jnp.float32)],
        ),
        compiler_params=pltpu.CompilerParams(
            dimension_semantics=("parallel", "parallel", "arbitrary"),
            vmem_limit_bytes=_VMEM_LIMIT_BYTES),
    )(a, b, bias)


# --------------------------------------------------------------------------
# Sequential LSTM recurrence kernel (only h @ W_hh remains in the hot loop).
# --------------------------------------------------------------------------
def _lstm_recurrence_kernel(gx_ref, w_hh_ref, h_out_ref, h_ref, c_ref):
    # gx_ref:    [TS, 4, B, H]  precomputed x@W_ih + (b_ih+b_hh), per-gate slabs
    # w_hh_ref:  [4, H, H]      recurrent weights, per-gate slabs (VMEM-resident)
    # h_out_ref: [TS, B, H]     hidden states for this time block
    # h_ref/c_ref: [B, H]       state carried across grid iterations (VMEM)
    @pl.when(pl.program_id(0) == 0)
    def _():
        h_ref[...] = jnp.zeros_like(h_ref)
        c_ref[...] = jnp.zeros_like(c_ref)

    # Hoisted once per time block (not per step).
    w_i = w_hh_ref[0]
    w_f = w_hh_ref[1]
    w_g = w_hh_ref[2]
    w_o = w_hh_ref[3]

    num_steps = gx_ref.shape[0]

    def step(t, carry):
        h, c = carry
        gx = gx_ref[t]  # [4, B, H] -- each gate is its own lane-aligned slab
        i_g = jax.nn.sigmoid(
            gx[0] + jnp.dot(h, w_i, preferred_element_type=jnp.float32))
        f_g = jax.nn.sigmoid(
            gx[1] + jnp.dot(h, w_f, preferred_element_type=jnp.float32))
        g_g = jnp.tanh(
            gx[2] + jnp.dot(h, w_g, preferred_element_type=jnp.float32))
        o_g = jax.nn.sigmoid(
            gx[3] + jnp.dot(h, w_o, preferred_element_type=jnp.float32))
        c_new = f_g * c + i_g * g_g
        h_new = o_g * jnp.tanh(c_new)
        h_out_ref[t] = h_new
        return h_new, c_new

    # Unrolled inner loop over the TS time steps of this block: h/c stay in
    # vregs between steps, and the LLO scheduler sees the whole block.
    h_fin, c_fin = jax.lax.fori_loop(
        0, num_steps, step, (h_ref[...], c_ref[...]), unroll=True)
    h_ref[...] = h_fin
    c_ref[...] = c_fin


def _largest_divisor_not_exceeding(n, cap):
    for d in range(min(n, cap), 0, -1):
        if n % d == 0:
            return d
    return 1


# --------------------------------------------------------------------------
# Full forward pass (eval mode), fused under a single jit.
# --------------------------------------------------------------------------
@functools.partial(jax.jit, static_argnames=("time_block",))
def lstm_lm_forward(token_ids, emb_table, w_ih, w_hh, b_gates, w_out, b_out,
                    *, time_block=16):
    """Forward pass of LM_LSTM_Dropout (eval mode).

    token_ids: [B, T] int32
    returns:   [B, V, T] float32 (matches PyTorch .permute(0, 2, 1))
    """
    B, T = token_ids.shape
    E = emb_table.shape[1]
    H = w_hh.shape[0]
    V = w_out.shape[1]

    # --- embedding lookup + embedding dropout (identity, eval mode) --------
    emb = jnp.take(emb_table, token_ids, axis=0)        # [B, T, E]
    emb_tm = jnp.transpose(emb, (1, 0, 2))              # [T, B, E] time-major

    # --- phase 1: time-parallel input projection (one big MXU matmul) ------
    gates_x = _matmul_bias(emb_tm.reshape(T * B, E), w_ih, b_gates)  # [T*B, 4H]
    # Per-gate lane-aligned layout for the recurrence: [T, 4, B, H].
    gates_x = gates_x.reshape(T, B, 4, H).transpose(0, 2, 1, 3)

    # Per-gate recurrent weights [4, H, H] (gate order i, f, g, o).
    w_hh4 = w_hh.reshape(H, 4, H).transpose(1, 0, 2)

    # --- phase 2: sequential recurrence over blocks of TS time steps -------
    TS = _largest_divisor_not_exceeding(T, time_block)
    grid_spec = pltpu.PrefetchScalarGridSpec(
        num_scalar_prefetch=0,
        grid=(T // TS,),
        in_specs=[
            pl.BlockSpec((TS, 4, B, H), lambda s: (s, 0, 0, 0)),  # gates_x
            pl.BlockSpec((4, H, H), lambda s: (0, 0, 0)),         # W_hh (resident)
        ],
        out_specs=pl.BlockSpec((TS, B, H), lambda s: (s, 0, 0)),
        scratch_shapes=[
            pltpu.VMEM((B, H), jnp.float32),   # h state
            pltpu.VMEM((B, H), jnp.float32),   # c state
        ],
    )
    h_all = pl.pallas_call(
        _lstm_recurrence_kernel,
        out_shape=jax.ShapeDtypeStruct((T, B, H), jnp.float32),
        grid_spec=grid_spec,
        compiler_params=pltpu.CompilerParams(
            dimension_semantics=("arbitrary",),   # time recurrence is sequential
            vmem_limit_bytes=_VMEM_LIMIT_BYTES),
    )(gates_x, w_hh4)

    # output dropout: identity (eval mode)

    # --- phase 3: time-parallel output projection (one big MXU matmul) -----
    logits = _matmul_bias(h_all.reshape(T * B, H), w_out, b_out)  # [T*B, V]
    logits = logits.reshape(T, B, V)

    # [T, B, V] -> permute to [B, V, T]  (matches .permute(0, 2, 1))
    return jnp.transpose(logits, (1, 2, 0))


# --------------------------------------------------------------------------
# Pure-JAX reference (lax.scan LSTM) for correctness checking.
# --------------------------------------------------------------------------
def _reference_forward(token_ids, emb_table, w_ih, w_hh, b_gates, w_out, b_out):
    emb = jnp.take(emb_table, token_ids, axis=0)        # [B, T, E]
    B = emb.shape[0]
    H = w_hh.shape[0]

    def step(carry, x_t):
        h, c = carry
        gates = x_t @ w_ih + h @ w_hh + b_gates[0]
        i_g = jax.nn.sigmoid(gates[:, 0 * H:1 * H])
        f_g = jax.nn.sigmoid(gates[:, 1 * H:2 * H])
        g_g = jnp.tanh(gates[:, 2 * H:3 * H])
        o_g = jax.nn.sigmoid(gates[:, 3 * H:4 * H])
        c_new = f_g * c + i_g * g_g
        h_new = o_g * jnp.tanh(c_new)
        return (h_new, c_new), h_new

    init = (jnp.zeros((B, H), jnp.float32), jnp.zeros((B, H), jnp.float32))
    _, hs = jax.lax.scan(step, init, jnp.transpose(emb, (1, 0, 2)))  # [T, B, H]
    logits = hs @ w_out + b_out[0]                                   # [T, B, V]
    return jnp.transpose(logits, (1, 2, 0))                          # [B, V, T]


if __name__ == "__main__":
    # Small shapes consistent with the module's forward.
    B, T = 2, 8           # batch, sequence length
    E, H, V = 32, 32, 64  # emb_size, hidden_size, output_size (vocab)
    PAD = 0

    key = jax.random.PRNGKey(0)
    k_emb, k_ih, k_hh, k_b, k_wo, k_bo, k_tok = jax.random.split(key, 7)

    # Deterministic parameter init (shapes follow nn.Embedding / nn.LSTM / nn.Linear).
    emb_table = 0.1 * jax.random.normal(k_emb, (V, E), jnp.float32)
    emb_table = emb_table.at[PAD].set(0.0)                            # padding_idx=0
    w_ih = 0.1 * jax.random.normal(k_ih, (E, 4 * H), jnp.float32)     # weight_ih_l0.T
    w_hh = 0.1 * jax.random.normal(k_hh, (H, 4 * H), jnp.float32)     # weight_hh_l0.T
    b_gates = 0.1 * jax.random.normal(k_b, (1, 4 * H), jnp.float32)   # b_ih + b_hh
    w_out = 0.1 * jax.random.normal(k_wo, (H, V), jnp.float32)        # output.weight.T
    b_out = 0.1 * jax.random.normal(k_bo, (1, V), jnp.float32)        # output.bias

    token_ids = jax.random.randint(k_tok, (B, T), 0, V, jnp.int32)

    out = lstm_lm_forward(token_ids, emb_table, w_ih, w_hh, b_gates, w_out, b_out)
    out = jax.block_until_ready(out)
    assert out.shape == (B, V, T), out.shape

    ref = jax.block_until_ready(
        _reference_forward(token_ids, emb_table, w_ih, w_hh, b_gates, w_out, b_out))
    np.testing.assert_allclose(np.asarray(out), np.asarray(ref),
                               rtol=1e-5, atol=1e-5)

    print("KERNEL_OK")
</pallas_src>

<mosaic_0001>
module attributes {stable_mosaic.version = 11 : i64} {
  func.func @_matmul_bias_kernel(%arg0: i32, %arg1: i32, %arg2: i32, %arg3: memref<16x32xf32, #tpu.memory_space<vmem>>, %arg4: memref<32x128xf32, #tpu.memory_space<vmem>>, %arg5: memref<1x128xf32, #tpu.memory_space<vmem>>, %arg6: memref<16x128xf32, #tpu.memory_space<vmem>>, %arg7: memref<16x128xf32, #tpu.memory_space<vmem>>) attributes {dimension_semantics = [#tpu.dimension_semantics<parallel>, #tpu.dimension_semantics<parallel>, #tpu.dimension_semantics<arbitrary>], iteration_bounds = array<i64: 1, 1, 1>, scalar_prefetch = 0 : i64, scratch_operands = 1 : i64, tpu.core_type = #tpu.core_type<tc>, window_params = [{transform_indices = @transform_0, window_bounds = array<i64: 16, 32>}, {transform_indices = @transform_1, window_bounds = array<i64: 32, 128>}, {transform_indices = @transform_2, window_bounds = array<i64: 1, 128>}, {transform_indices = @transform_3, window_bounds = array<i64: 16, 128>}]} {
    %c0_i32 = arith.constant 0 : i32
    %0 = arith.cmpi eq, %arg2, %c0_i32 : i32
    %1 = arith.extui %0 : i1 to i32
    %c0_i32_0 = arith.constant 0 : i32
    %2 = arith.cmpi ne, %1, %c0_i32_0 : i32
    scf.if %2 {
      %cst_10 = arith.constant 0.000000e+00 : f32
      %12 = vector.broadcast %cst_10 : f32 to vector<16x128xf32>
      %c0_11 = arith.constant 0 : index
      %c0_12 = arith.constant 0 : index
      %13 = vector.load %arg7[%c0_11, %c0_12] : memref<16x128xf32, #tpu.memory_space<vmem>>, vector<16x128xf32>
      tpu.vector_store %arg7[%c0_11, %c0_12], %12 {strides = array<i32>} : memref<16x128xf32, #tpu.memory_space<vmem>>, vector<16x128xf32>,
    } else {
    }
    %c0 = arith.constant 0 : index
    %c0_1 = arith.constant 0 : index
    %3 = vector.load %arg7[%c0, %c0_1] : memref<16x128xf32, #tpu.memory_space<vmem>>, vector<16x128xf32>
    %c0_2 = arith.constant 0 : index
    %c0_3 = arith.constant 0 : index
    %4 = vector.load %arg3[%c0_2, %c0_3] : memref<16x32xf32, #tpu.memory_space<vmem>>, vector<16x32xf32>
    %c0_4 = arith.constant 0 : index
    %c0_5 = arith.constant 0 : index
    %5 = vector.load %arg4[%c0_4, %c0_5] : memref<32x128xf32, #tpu.memory_space<vmem>>, vector<32x128xf32>
    %cst = arith.constant dense<0.000000e+00> : vector<16x128xf32>
    %6 = tpu.matmul %4, %5, %cst {dimension_numbers = #tpu.dot_dimension_numbers<[1], [0], [0], [1], [0, 0, 1, 1], [], []>} : vector<16x32xf32>, vector<32x128xf32>, vector<16x128xf32> -> vector<16x128xf32>
    %7 = arith.addf %3, %6 : vector<16x128xf32>
    %c0_6 = arith.constant 0 : index
    %c0_7 = arith.constant 0 : index
    %8 = vector.load %arg7[%c0_6, %c0_7] : memref<16x128xf32, #tpu.memory_space<vmem>>, vector<16x128xf32>
    tpu.vector_store %arg7[%c0_6, %c0_7], %7 {strides = array<i32>} : memref<16x128xf32, #tpu.memory_space<vmem>>, vector<16x128xf32>,
    %c0_i32_8 = arith.constant 0 : i32
    %9 = arith.cmpi eq, %arg2, %c0_i32_8 : i32
    %10 = arith.extui %9 : i1 to i32
    %c0_i32_9 = arith.constant 0 : i32
    %11 = arith.cmpi ne, %10, %c0_i32_9 : i32
    scf.if %11 {
      %c0_10 = arith.constant 0 : index
      %c0_11 = arith.constant 0 : index
      %12 = vector.load %arg7[%c0_10, %c0_11] : memref<16x128xf32, #tpu.memory_space<vmem>>, vector<16x128xf32>
      %c0_12 = arith.constant 0 : index
      %c0_13 = arith.constant 0 : index
      %13 = vector.load %arg5[%c0_12, %c0_13] : memref<1x128xf32, #tpu.memory_space<vmem>>, vector<1x128xf32>
      %14 = vector.broadcast %13 : vector<1x128xf32> to vector<16x128xf32>
      %15 = arith.addf %12, %14 : vector<16x128xf32>
      %c0_14 = arith.constant 0 : index
      %c0_15 = arith.constant 0 : index
      %16 = vector.load %arg6[%c0_14, %c0_15] : memref<16x128xf32, #tpu.memory_space<vmem>>, vector<16x128xf32>
      tpu.vector_store %arg6[%c0_14, %c0_15], %15 {strides = array<i32>} : memref<16x128xf32, #tpu.memory_space<vmem>>, vector<16x128xf32>,
    } else {
    }
    return
  }
  func.func @transform_0(%arg0: i32, %arg1: i32, %arg2: i32) -> (i32, i32) {
    %c0_i32 = arith.constant 0 : i32
    return %arg0, %arg2 : i32, i32
  }
  func.func @transform_1(%arg0: i32, %arg1: i32, %arg2: i32) -> (i32, i32) {
    %c0_i32 = arith.constant 0 : i32
    return %arg2, %arg1 : i32, i32
  }
  func.func @transform_2(%arg0: i32, %arg1: i32, %arg2: i32) -> (i32, i32) {
    %c0_i32 = arith.constant 0 : i32
    %c0_i32_0 = arith.constant 0 : i32
    return %c0_i32, %arg1 : i32, i32
  }
  func.func @transform_3(%arg0: i32, %arg1: i32, %arg2: i32) -> (i32, i32) {
    %c0_i32 = arith.constant 0 : i32
    return %arg0, %arg1 : i32, i32
  }
}

module attributes {stable_mosaic.version = 11 : i64} {
  func.func @_matmul_bias_kernel(%arg0: i32, %arg1: i32, %arg2: i32, %arg3: memref<16x32xf32, #tpu.memory_space<vmem>>, %arg4: memref<32x64xf32, #tpu.memory_space<vmem>>, %arg5: memref<1x64xf32, #tpu.memory_space<vmem>>, %arg6: memref<16x64xf32, #tpu.memory_space<vmem>>, %arg7: memref<16x64xf32, #tpu.memory_space<vmem>>) attributes {dimension_semantics = [#tpu.dimension_semantics<parallel>, #tpu.dimension_semantics<parallel>, #tpu.dimension_semantics<arbitrary>], iteration_bounds = array<i64: 1, 1, 1>, scalar_prefetch = 0 : i64, scratch_operands = 1 : i64, tpu.core_type = #tpu.core_type<tc>, window_params = [{transform_indices = @transform_0, window_bounds = array<i64: 16, 32>}, {transform_indices = @transform_1, window_bounds = array<i64: 32, 64>}, {transform_indices = @transform_2, window_bounds = array<i64: 1, 64>}, {transform_indices = @transform_3, window_bounds = array<i64: 16, 64>}]} {
    %c0_i32 = arith.constant 0 : i32
    %0 = arith.cmpi eq, %arg2, %c0_i32 : i32
    %1 = arith.extui %0 : i1 to i32
    %c0_i32_0 = arith.constant 0 : i32
    %2 = arith.cmpi ne, %1, %c0_i32_0 : i32
    scf.if %2 {
      %cst_10 = arith.constant 0.000000e+00 : f32
      %12 = vector.broadcast %cst_10 : f32 to vector<16x64xf32>
      %c0_11 = arith.constant 0 : index
      %c0_12 = arith.constant 0 : index
      %13 = vector.load %arg7[%c0_11, %c0_12] : memref<16x64xf32, #tpu.memory_space<vmem>>, vector<16x64xf32>
      tpu.vector_store %arg7[%c0_11, %c0_12], %12 {strides = array<i32>} : memref<16x64xf32, #tpu.memory_space<vmem>>, vector<16x64xf32>,
    } else {
    }
    %c0 = arith.constant 0 : index
    %c0_1 = arith.constant 0 : index
    %3 = vector.load %arg7[%c0, %c0_1] : memref<16x64xf32, #tpu.memory_space<vmem>>, vector<16x64xf32>
    %c0_2 = arith.constant 0 : index
    %c0_3 = arith.constant 0 : index
    %4 = vector.load %arg3[%c0_2, %c0_3] : memref<16x32xf32, #tpu.memory_space<vmem>>, vector<16x32xf32>
    %c0_4 = arith.constant 0 : index
    %c0_5 = arith.constant 0 : index
    %5 = vector.load %arg4[%c0_4, %c0_5] : memref<32x64xf32, #tpu.memory_space<vmem>>, vector<32x64xf32>
    %cst = arith.constant dense<0.000000e+00> : vector<16x64xf32>
    %6 = tpu.matmul %4, %5, %cst {dimension_numbers = #tpu.dot_dimension_numbers<[1], [0], [0], [1], [0, 0, 1, 1], [], []>} : vector<16x32xf32>, vector<32x64xf32>, vector<16x64xf32> -> vector<16x64xf32>
    %7 = arith.addf %3, %6 : vector<16x64xf32>
    %c0_6 = arith.constant 0 : index
    %c0_7 = arith.constant 0 : index
    %8 = vector.load %arg7[%c0_6, %c0_7] : memref<16x64xf32, #tpu.memory_space<vmem>>, vector<16x64xf32>
    tpu.vector_store %arg7[%c0_6, %c0_7], %7 {strides = array<i32>} : memref<16x64xf32, #tpu.memory_space<vmem>>, vector<16x64xf32>,
    %c0_i32_8 = arith.constant 0 : i32
    %9 = arith.cmpi eq, %arg2, %c0_i32_8 : i32
    %10 = arith.extui %9 : i1 to i32
    %c0_i32_9 = arith.constant 0 : i32
    %11 = arith.cmpi ne, %10, %c0_i32_9 : i32
    scf.if %11 {
      %c0_10 = arith.constant 0 : index
      %c0_11 = arith.constant 0 : index
      %12 = vector.load %arg7[%c0_10, %c0_11] : memref<16x64xf32, #tpu.memory_space<vmem>>, vector<16x64xf32>
      %c0_12 = arith.constant 0 : index
      %c0_13 = arith.constant 0 : index
      %13 = vector.load %arg5[%c0_12, %c0_13] : memref<1x64xf32, #tpu.memory_space<vmem>>, vector<1x64xf32>
      %14 = vector.broadcast %13 : vector<1x64xf32> to vector<16x64xf32>
      %15 = arith.addf %12, %14 : vector<16x64xf32>
      %c0_14 = arith.constant 0 : index
      %c0_15 = arith.constant 0 : index
      %16 = vector.load %arg6[%c0_14, %c0_15] : memref<16x64xf32, #tpu.memory_space<vmem>>, vector<16x64xf32>
      tpu.vector_store %arg6[%c0_14, %c0_15], %15 {strides = array<i32>} : memref<16x64xf32, #tpu.memory_space<vmem>>, vector<16x64xf32>,
    } else {
    }
    return
  }
  func.func @transform_0(%arg0: i32, %arg1: i32, %arg2: i32) -> (i32, i32) {
    %c0_i32 = arith.constant 0 : i32
    return %arg0, %arg2 : i32, i32
  }
  func.func @transform_1(%arg0: i32, %arg1: i32, %arg2: i32) -> (i32, i32) {
    %c0_i32 = arith.constant 0 : i32
    return %arg2, %arg1 : i32, i32
  }
  func.func @transform_2(%arg0: i32, %arg1: i32, %arg2: i32) -> (i32, i32) {
    %c0_i32 = arith.constant 0 : i32
    %c0_i32_0 = arith.constant 0 : i32
    return %c0_i32, %arg1 : i32, i32
  }
  func.func @transform_3(%arg0: i32, %arg1: i32, %arg2: i32) -> (i32, i32) {
    %c0_i32 = arith.constant 0 : i32
    return %arg0, %arg1 : i32, i32
  }
}

module attributes {stable_mosaic.version = 11 : i64} {
  func.func @_lstm_recurrence_kernel(%arg0: i32, %arg1: memref<8x4x2x32xf32, #tpu.memory_space<vmem>>, %arg2: memref<4x32x32xf32, #tpu.memory_space<vmem>>, %arg3: memref<8x2x32xf32, #tpu.memory_space<vmem>>, %arg4: memref<2x32xf32, #tpu.memory_space<vmem>>, %arg5: memref<2x32xf32, #tpu.memory_space<vmem>>) attributes {dimension_semantics = [#tpu.dimension_semantics<arbitrary>], iteration_bounds = array<i64: 1>, scalar_prefetch = 0 : i64, scratch_operands = 2 : i64, tpu.core_type = #tpu.core_type<tc>, window_params = [{transform_indices = @transform_0, window_bounds = array<i64: 8, 4, 2, 32>}, {pipeline_mode = #tpu.pipeline_mode<synchronous>, transform_indices = @transform_1, window_bounds = array<i64: 4, 32, 32>}, {transform_indices = @transform_2, window_bounds = array<i64: 8, 2, 32>}]} {
    %c0_i32 = arith.constant 0 : i32
    %0 = arith.cmpi eq, %arg0, %c0_i32 : i32
    %1 = arith.extui %0 : i1 to i32
    %c0_i32_0 = arith.constant 0 : i32
    %2 = arith.cmpi ne, %1, %c0_i32_0 : i32
    scf.if %2 {
      %cst_113 = arith.constant 0.000000e+00 : f32
      %367 = vector.broadcast %cst_113 : f32 to vector<2x32xf32>
      %c0_114 = arith.constant 0 : index
      %c0_115 = arith.constant 0 : index
      %368 = vector.load %arg4[%c0_114, %c0_115] : memref<2x32xf32, #tpu.memory_space<vmem>>, vector<2x32xf32>
      tpu.vector_store %arg4[%c0_114, %c0_115], %367 {strides = array<i32>} : memref<2x32xf32, #tpu.memory_space<vmem>>, vector<2x32xf32>,
      %cst_116 = arith.constant 0.000000e+00 : f32
      %369 = vector.broadcast %cst_116 : f32 to vector<2x32xf32>
      %c0_117 = arith.constant 0 : index
      %c0_118 = arith.constant 0 : index
      %370 = vector.load %arg5[%c0_117, %c0_118] : memref<2x32xf32, #tpu.memory_space<vmem>>, vector<2x32xf32>
      tpu.vector_store %arg5[%c0_117, %c0_118], %369 {strides = array<i32>} : memref<2x32xf32, #tpu.memory_space<vmem>>, vector<2x32xf32>,
    } else {
    }
    %c0 = arith.constant 0 : index
    %c0_1 = arith.constant 0 : index
    %c0_2 = arith.constant 0 : index
    %3 = vector.load %arg2[%c0, %c0_1, %c0_2] : memref<4x32x32xf32, #tpu.memory_space<vmem>>, vector<1x32x32xf32>
    %4 = vector.shape_cast %3 : vector<1x32x32xf32> to vector<32x32xf32>
    %c1 = arith.constant 1 : index
    %c0_3 = arith.constant 0 : index
    %c0_4 = arith.constant 0 : index
    %5 = vector.load %arg2[%c1, %c0_3, %c0_4] : memref<4x32x32xf32, #tpu.memory_space<vmem>>, vector<1x32x32xf32>
    %6 = vector.shape_cast %5 : vector<1x32x32xf32> to vector<32x32xf32>
    %c2 = arith.constant 2 : index
    %c0_5 = arith.constant 0 : index
    %c0_6 = arith.constant 0 : index
    %7 = vector.load %arg2[%c2, %c0_5, %c0_6] : memref<4x32x32xf32, #tpu.memory_space<vmem>>, vector<1x32x32xf32>
    %8 = vector.shape_cast %7 : vector<1x32x32xf32> to vector<32x32xf32>
    %c3 = arith.constant 3 : index
    %c0_7 = arith.constant 0 : index
    %c0_8 = arith.constant 0 : index
    %9 = vector.load %arg2[%c3, %c0_7, %c0_8] : memref<4x32x32xf32, #tpu.memory_space<vmem>>, vector<1x32x32xf32>
    %10 = vector.shape_cast %9 : vector<1x32x32xf32> to vector<32x32xf32>
    %c0_9 = arith.constant 0 : index
    %c0_10 = arith.constant 0 : index
    %11 = vector.load %arg4[%c0_9, %c0_10] : memref<2x32xf32, #tpu.memory_space<vmem>>, vector<2x32xf32>
    %c0_11 = arith.constant 0 : index
    %c0_12 = arith.constant 0 : index
    %12 = vector.load %arg5[%c0_11, %c0_12] : memref<2x32xf32, #tpu.memory_space<vmem>>, vector<2x32xf32>
    %c0_i32_13 = arith.constant 0 : i32
    %13 = arith.index_cast %c0_i32_13 : i32 to index
    %c0_14 = arith.constant 0 : index
    %c0_15 = arith.constant 0 : index
    %c0_16 = arith.constant 0 : index
    %14 = vector.load %arg1[%13, %c0_14, %c0_15, %c0_16] : memref<8x4x2x32xf32, #tpu.memory_space<vmem>>, vector<1x4x2x32xf32>
    %15 = vector.shape_cast %14 : vector<1x4x2x32xf32> to vector<4x2x32xf32>
    %16 = vector.extract_strided_slice %15 {offsets = [0, 0, 0], sizes = [1, 2, 32], strides = [1, 1, 1]} : vector<4x2x32xf32> to vector<1x2x32xf32>
    %17 = vector.shape_cast %16 : vector<1x2x32xf32> to vector<2x32xf32>
    %cst = arith.constant dense<0.000000e+00> : vector<2x32xf32>
    %18 = tpu.matmul %11, %4, %cst {dimension_numbers = #tpu.dot_dimension_numbers<[1], [0], [0], [1], [0, 0, 1, 1], [], []>} : vector<2x32xf32>, vector<32x32xf32>, vector<2x32xf32> -> vector<2x32xf32>
    %19 = arith.addf %17, %18 : vector<2x32xf32>
    %20 = arith.negf %19 : vector<2x32xf32>
    %21 = math.exp %20 : vector<2x32xf32>
    %cst_17 = arith.constant 1.000000e+00 : f32
    %22 = vector.broadcast %cst_17 : f32 to vector<2x32xf32>
    %23 = arith.addf %22, %21 : vector<2x32xf32>
    %24 = arith.divf %22, %23 : vector<2x32xf32>
    %25 = vector.extract_strided_slice %15 {offsets = [1, 0, 0], sizes = [1, 2, 32], strides = [1, 1, 1]} : vector<4x2x32xf32> to vector<1x2x32xf32>
    %26 = vector.shape_cast %25 : vector<1x2x32xf32> to vector<2x32xf32>
    %cst_18 = arith.constant dense<0.000000e+00> : vector<2x32xf32>
    %27 = tpu.matmul %11, %6, %cst_18 {dimension_numbers = #tpu.dot_dimension_numbers<[1], [0], [0], [1], [0, 0, 1, 1], [], []>} : vector<2x32xf32>, vector<32x32xf32>, vector<2x32xf32> -> vector<2x32xf32>
    %28 = arith.addf %26, %27 : vector<2x32xf32>
    %29 = arith.negf %28 : vector<2x32xf32>
    %30 = math.exp %29 : vector<2x32xf32>
    %cst_19 = arith.constant 1.000000e+00 : f32
    %31 = vector.broadcast %cst_19 : f32 to vector<2x32xf32>
    %32 = arith.addf %31, %30 : vector<2x32xf32>
    %33 = arith.divf %31, %32 : vector<2x32xf32>
    %34 = vector.extract_strided_slice %15 {offsets = [2, 0, 0], sizes = [1, 2, 32], strides = [1, 1, 1]} : vector<4x2x32xf32> to vector<1x2x32xf32>
    %35 = vector.shape_cast %34 : vector<1x2x32xf32> to vector<2x32xf32>
    %cst_20 = arith.constant dense<0.000000e+00> : vector<2x32xf32>
    %36 = tpu.matmul %11, %8, %cst_20 {dimension_numbers = #tpu.dot_dimension_numbers<[1], [0], [0], [1], [0, 0, 1, 1], [], []>} : vector<2x32xf32>, vector<32x32xf32>, vector<2x32xf32> -> vector<2x32xf32>
    %37 = arith.addf %35, %36 : vector<2x32xf32>
    %38 = math.tanh %37 : vector<2x32xf32>
    %39 = vector.extract_strided_slice %15 {offsets = [3, 0, 0], sizes = [1, 2, 32], strides = [1, 1, 1]} : vector<4x2x32xf32> to vector<1x2x32xf32>
    %40 = vector.shape_cast %39 : vector<1x2x32xf32> to vector<2x32xf32>
    %cst_21 = arith.constant dense<0.000000e+00> : vector<2x32xf32>
    %41 = tpu.matmul %11, %10, %cst_21 {dimension_numbers = #tpu.dot_dimension_numbers<[1], [0], [0], [1], [0, 0, 1, 1], [], []>} : vector<2x32xf32>, vector<32x32xf32>, vector<2x32xf32> -> vector<2x32xf32>
    %42 = arith.addf %40, %41 : vector<2x32xf32>
    %43 = arith.negf %42 : vector<2x32xf32>
    %44 = math.exp %43 : vector<2x32xf32>
    %cst_22 = arith.constant 1.000000e+00 : f32
    %45 = vector.broadcast %cst_22 : f32 to vector<2x32xf32>
    %46 = arith.addf %45, %44 : vector<2x32xf32>
    %47 = arith.divf %45, %46 : vector<2x32xf32>
    %48 = arith.mulf %33, %12 : vector<2x32xf32>
    %49 = arith.mulf %24, %38 : vector<2x32xf32>
    %50 = arith.addf %48, %49 : vector<2x32xf32>
    %51 = math.tanh %50 : vector<2x32xf32>
    %52 = arith.mulf %47, %51 : vector<2x32xf32>
    %53 = arith.index_cast %c0_i32_13 : i32 to index
    %c0_23 = arith.constant 0 : index
    %c0_24 = arith.constant 0 : index
    %54 = vector.load %arg3[%53, %c0_23, %c0_24] : memref<8x2x32xf32, #tpu.memory_space<vmem>>, vector<1x2x32xf32>
    %55 = vector.shape_cast %54 : vector<1x2x32xf32> to vector<2x32xf32>
    %56 = vector.shape_cast %52 : vector<2x32xf32> to vector<1x2x32xf32>
    tpu.vector_store %arg3[%53, %c0_23, %c0_24], %56 {strides = array<i32>} : memref<8x2x32xf32, #tpu.memory_space<vmem>>, vector<1x2x32xf32>,
    %c1_i32 = arith.constant 1 : i32
    %57 = arith.index_cast %c1_i32 : i32 to index
    %c0_25 = arith.constant 0 : index
    %c0_26 = arith.constant 0 : index
    %c0_27 = arith.constant 0 : index
    %58 = vector.load %arg1[%57, %c0_25, %c0_26, %c0_27] : memref<8x4x2x32xf32, #tpu.memory_space<vmem>>, vector<1x4x2x32xf32>
    %59 = vector.shape_cast %58 : vector<1x4x2x32xf32> to vector<4x2x32xf32>
    %60 = vector.extract_strided_slice %59 {offsets = [0, 0, 0], sizes = [1, 2, 32], strides = [1, 1, 1]} : vector<4x2x32xf32> to vector<1x2x32xf32>
    %61 = vector.shape_cast %60 : vector<1x2x32xf32> to vector<2x32xf32>
    %cst_28 = arith.constant dense<0.000000e+00> : vector<2x32xf32>
    %62 = tpu.matmul %52, %4, %cst_28 {dimension_numbers = #tpu.dot_dimension_numbers<[1], [0], [0], [1], [0, 0, 1, 1], [], []>} : vector<2x32xf32>, vector<32x32xf32>, vector<2x32xf32> -> vector<2x32xf32>
    %63 = arith.addf %61, %62 : vector<2x32xf32>
    %64 = arith.negf %63 : vector<2x32xf32>
    %65 = math.exp %64 : vector<2x32xf32>
    %cst_29 = arith.constant 1.000000e+00 : f32
    %66 = vector.broadcast %cst_29 : f32 to vector<2x32xf32>
    %67 = arith.addf %66, %65 : vector<2x32xf32>
    %68 = arith.divf %66, %67 : vector<2x32xf32>
    %69 = vector.extract_strided_slice %59 {offsets = [1, 0, 0], sizes = [1, 2, 32], strides = [1, 1, 1]} : vector<4x2x32xf32> to vector<1x2x32xf32>
    %70 = vector.shape_cast %69 : vector<1x2x32xf32> to vector<2x32xf32>
    %cst_30 = arith.constant dense<0.000000e+00> : vector<2x32xf32>
    %71 = tpu.matmul %52, %6, %cst_30 {dimension_numbers = #tpu.dot_dimension_numbers<[1], [0], [0], [1], [0, 0, 1, 1], [], []>} : vector<2x32xf32>, vector<32x32xf32>, vector<2x32xf32> -> vector<2x32xf32>
    %72 = arith.addf %70, %71 : vector<2x32xf32>
    %73 = arith.negf %72 : vector<2x32xf32>
    %74 = math.exp %73 : vector<2x32xf32>
    %cst_31 = arith.constant 1.000000e+00 : f32
    %75 = vector.broadcast %cst_31 : f32 to vector<2x32xf32>
    %76 = arith.addf %75, %74 : vector<2x32xf32>
    %77 = arith.divf %75, %76 : vector<2x32xf32>
    %78 = vector.extract_strided_slice %59 {offsets = [2, 0, 0], sizes = [1, 2, 32], strides = [1, 1, 1]} : vector<4x2x32xf32> to vector<1x2x32xf32>
    %79 = vector.shape_cast %78 : vector<1x2x32xf32> to vector<2x32xf32>
    %cst_32 = arith.constant dense<0.000000e+00> : vector<2x32xf32>
    %80 = tpu.matmul %52, %8, %cst_32 {dimension_numbers = #tpu.dot_dimension_numbers<[1], [0], [0], [1], [0, 0, 1, 1], [], []>} : vector<2x32xf32>, vector<32x32xf32>, vector<2x32xf32> -> vector<2x32xf32>
    %81 = arith.addf %79, %80 : vector<2x32xf32>
    %82 = math.tanh %81 : vector<2x32xf32>
    %83 = vector.extract_strided_slice %59 {offsets = [3, 0, 0], sizes = [1, 2, 32], strides = [1, 1, 1]} : vector<4x2x32xf32> to vector<1x2x32xf32>
    %84 = vector.shape_cast %83 : vector<1x2x32xf32> to vector<2x32xf32>
    %cst_33 = arith.constant dense<0.000000e+00> : vector<2x32xf32>
    %85 = tpu.matmul %52, %10, %cst_33 {dimension_numbers = #tpu.dot_dimension_numbers<[1], [0], [0], [1], [0, 0, 1, 1], [], []>} : vector<2x32xf32>, vector<32x32xf32>, vector<2x32xf32> -> vector<2x32xf32>
    %86 = arith.addf %84, %85 : vector<2x32xf32>
    %87 = arith.negf %86 : vector<2x32xf32>
    %88 = math.exp %87 : vector<2x32xf32>
    %cst_34 = arith.constant 1.000000e+00 : f32
    %89 = vector.broadcast %cst_34 : f32 to vector<2x32xf32>
    %90 = arith.addf %89, %88 : vector<2x32xf32>
    %91 = arith.divf %89, %90 : vector<2x32xf32>
    %92 = arith.mulf %77, %50 : vector<2x32xf32>
    %93 = arith.mulf %68, %82 : vector<2x32xf32>
    %94 = arith.addf %92, %93 : vector<2x32xf32>
    %95 = math.tanh %94 : vector<2x32xf32>
    %96 = arith.mulf %91, %95 : vector<2x32xf32>
    %97 = arith.index_cast %c1_i32 : i32 to index
    %c0_35 = arith.constant 0 : index
    %c0_36 = arith.constant 0 : index
    %98 = vector.load %arg3[%97, %c0_35, %c0_36] : memref<8x2x32xf32, #tpu.memory_space<vmem>>, vector<1x2x32xf32>
    %99 = vector.shape_cast %98 : vector<1x2x32xf32> to vector<2x32xf32>
    %100 = vector.shape_cast %96 : vector<2x32xf32> to vector<1x2x32xf32>
    tpu.vector_store %arg3[%97, %c0_35, %c0_36], %100 {strides = array<i32>} : memref<8x2x32xf32, #tpu.memory_space<vmem>>, vector<1x2x32xf32>,
    %c2_i32 = arith.constant 2 : i32
    %101 = arith.index_cast %c2_i32 : i32 to index
    %c0_37 = arith.constant 0 : index
    %c0_38 = arith.constant 0 : index
    %c0_39 = arith.constant 0 : index
    %102 = vector.load %arg1[%101, %c0_37, %c0_38, %c0_39] : memref<8x4x2x32xf32, #tpu.memory_space<vmem>>, vector<1x4x2x32xf32>
    %103 = vector.shape_cast %102 : vector<1x4x2x32xf32> to vector<4x2x32xf32>
    %104 = vector.extract_strided_slice %103 {offsets = [0, 0, 0], sizes = [1, 2, 32], strides = [1, 1, 1]} : vector<4x2x32xf32> to vector<1x2x32xf32>
    %105 = vector.shape_cast %104 : vector<1x2x32xf32> to vector<2x32xf32>
    %cst_40 = arith.constant dense<0.000000e+00> : vector<2x32xf32>
    %106 = tpu.matmul %96, %4, %cst_40 {dimension_numbers = #tpu.dot_dimension_numbers<[1], [0], [0], [1], [0, 0, 1, 1], [], []>} : vector<2x32xf32>, vector<32x32xf32>, vector<2x32xf32> -> vector<2x32xf32>
    %107 = arith.addf %105, %106 : vector<2x32xf32>
    %108 = arith.negf %107 : vector<2x32xf32>
    %109 = math.exp %108 : vector<2x32xf32>
    %cst_41 = arith.constant 1.000000e+00 : f32
    %110 = vector.broadcast %cst_41 : f32 to vector<2x32xf32>
    %111 = arith.addf %110, %109 : vector<2x32xf32>
    %112 = arith.divf %110, %111 : vector<2x32xf32>
    %113 = vector.extract_strided_slice %103 {offsets = [1, 0, 0], sizes = [1, 2, 32], strides = [1, 1, 1]} : vector<4x2x32xf32> to vector<1x2x32xf32>
    %114 = vector.shape_cast %113 : vector<1x2x32xf32> to vector<2x32xf32>
    %cst_42 = arith.constant dense<0.000000e+00> : vector<2x32xf32>
    %115 = tpu.matmul %96, %6, %cst_42 {dimension_numbers = #tpu.dot_dimension_numbers<[1], [0], [0], [1], [0, 0, 1, 1], [], []>} : vector<2x32xf32>, vector<32x32xf32>, vector<2x32xf32> -> vector<2x32xf32>
    %116 = arith.addf %114, %115 : vector<2x32xf32>
    %117 = arith.negf %116 : vector<2x32xf32>
    %118 = math.exp %117 : vector<2x32xf32>
    %cst_43 = arith.constant 1.000000e+00 : f32
    %119 = vector.broadcast %cst_43 : f32 to vector<2x32xf32>
    %120 = arith.addf %119, %118 : vector<2x32xf32>
    %121 = arith.divf %119, %120 : vector<2x32xf32>
    %122 = vector.extract_strided_slice %103 {offsets = [2, 0, 0], sizes = [1, 2, 32], strides = [1, 1, 1]} : vector<4x2x32xf32> to vector<1x2x32xf32>
    %123 = vector.shape_cast %122 : vector<1x2x32xf32> to vector<2x32xf32>
    %cst_44 = arith.constant dense<0.000000e+00> : vector<2x32xf32>
    %124 = tpu.matmul %96, %8, %cst_44 {dimension_numbers = #tpu.dot_dimension_numbers<[1], [0], [0], [1], [0, 0, 1, 1], [], []>} : vector<2x32xf32>, vector<32x32xf32>, vector<2x32xf32> -> vector<2x32xf32>
    %125 = arith.addf %123, %124 : vector<2x32xf32>
    %126 = math.tanh %125 : vector<2x32xf32>
    %127 = vector.extract_strided_slice %103 {offsets = [3, 0, 0], sizes = [1, 2, 32], strides = [1, 1, 1]} : vector<4x2x32xf32> to vector<1x2x32xf32>
    %128 = vector.shape_cast %127 : vector<1x2x32xf32> to vector<2x32xf32>
    %cst_45 = arith.constant dense<0.000000e+00> : vector<2x32xf32>
    %129 = tpu.matmul %96, %10, %cst_45 {dimension_numbers = #tpu.dot_dimension_numbers<[1], [0], [0], [1], [0, 0, 1, 1], [], []>} : vector<2x32xf32>, vector<32x32xf32>, vector<2x32xf32> -> vector<2x32xf32>
    %130 = arith.addf %128, %129 : vector<2x32xf32>
    %131 = arith.negf %130 : vector<2x32xf32>
    %132 = math.exp %131 : vector<2x32xf32>
    %cst_46 = arith.constant 1.000000e+00 : f32
    %133 = vector.broadcast %cst_46 : f32 to vector<2x32xf32>
    %134 = arith.addf %133, %132 : vector<2x32xf32>
    %135 = arith.divf %133, %134 : vector<2x32xf32>
    %136 = arith.mulf %121, %94 : vector<2x32xf32>
    %137 = arith.mulf %112, %126 : vector<2x32xf32>
    %138 = arith.addf %136, %137 : vector<2x32xf32>
    %139 = math.tanh %138 : vector<2x32xf32>
    %140 = arith.mulf %135, %139 : vector<2x32xf32>
    %141 = arith.index_cast %c2_i32 : i32 to index
    %c0_47 = arith.constant 0 : index
    %c0_48 = arith.constant 0 : index
    %142 = vector.load %arg3[%141, %c0_47, %c0_48] : memref<8x2x32xf32, #tpu.memory_space<vmem>>, vector<1x2x32xf32>
    %143 = vector.shape_cast %142 : vector<1x2x32xf32> to vector<2x32xf32>
    %144 = vector.shape_cast %140 : vector<2x32xf32> to vector<1x2x32xf32>
    tpu.vector_store %arg3[%141, %c0_47, %c0_48], %144 {strides = array<i32>} : memref<8x2x32xf32, #tpu.memory_space<vmem>>, vector<1x2x32xf32>,
    %c3_i32 = arith.constant 3 : i32
    %145 = arith.index_cast %c3_i32 : i32 to index
    %c0_49 = arith.constant 0 : index
    %c0_50 = arith.constant 0 : index
    %c0_51 = arith.constant 0 : index
    %146 = vector.load %arg1[%145, %c0_49, %c0_50, %c0_51] : memref<8x4x2x32xf32, #tpu.memory_space<vmem>>, vector<1x4x2x32xf32>
    %147 = vector.shape_cast %146 : vector<1x4x2x32xf32> to vector<4x2x32xf32>
    %148 = vector.extract_strided_slice %147 {offsets = [0, 0, 0], sizes = [1, 2, 32], strides = [1, 1, 1]} : vector<4x2x32xf32> to vector<1x2x32xf32>
    %149 = vector.shape_cast %148 : vector<1x2x32xf32> to vector<2x32xf32>
    %cst_52 = arith.constant dense<0.000000e+00> : vector<2x32xf32>
    %150 = tpu.matmul %140, %4, %cst_52 {dimension_numbers = #tpu.dot_dimension_numbers<[1], [0], [0], [1], [0, 0, 1, 1], [], []>} : vector<2x32xf32>, vector<32x32xf32>, vector<2x32xf32> -> vector<2x32xf32>
    %151 = arith.addf %149, %150 : vector<2x32xf32>
    %152 = arith.negf %151 : vector<2x32xf32>
    %153 = math.exp %152 : vector<2x32xf32>
    %cst_53 = arith.constant 1.000000e+00 : f32
    %154 = vector.broadcast %cst_53 : f32 to vector<2x32xf32>
    %155 = arith.addf %154, %153 : vector<2x32xf32>
    %156 = arith.divf %154, %155 : vector<2x32xf32>
    %157 = vector.extract_strided_slice %147 {offsets = [1, 0, 0], sizes = [1, 2, 32], strides = [1, 1, 1]} : vector<4x2x32xf32> to vector<1x2x32xf32>
    %158 = vector.shape_cast %157 : vector<1x2x32xf32> to vector<2x32xf32>
    %cst_54 = arith.constant dense<0.000000e+00> : vector<2x32xf32>
    %159 = tpu.matmul %140, %6, %cst_54 {dimension_numbers = #tpu.dot_dimension_numbers<[1], [0], [0], [1], [0, 0, 1, 1], [], []>} : vector<2x32xf32>, vector<32x32xf32>, vector<2x32xf32> -> vector<2x32xf32>
    %160 = arith.addf %158, %159 : vector<2x32xf32>
    %161 = arith.negf %160 : vector<2x32xf32>
    %162 = math.exp %161 : vector<2x32xf32>
    %cst_55 = arith.constant 1.000000e+00 : f32
    %163 = vector.broadcast %cst_55 : f32 to vector<2x32xf32>
    %164 = arith.addf %163, %162 : vector<2x32xf32>
    %165 = arith.divf %163, %164 : vector<2x32xf32>
    %166 = vector.extract_strided_slice %147 {offsets = [2, 0, 0], sizes = [1, 2, 32], strides = [1, 1, 1]} : vector<4x2x32xf32> to vector<1x2x32xf32>
    %167 = vector.shape_cast %166 : vector<1x2x32xf32> to vector<2x32xf32>
    %cst_56 = arith.constant dense<0.000000e+00> : vector<2x32xf32>
    %168 = tpu.matmul %140, %8, %cst_56 {dimension_numbers = #tpu.dot_dimension_numbers<[1], [0], [0], [1], [0, 0, 1, 1], [], []>} : vector<2x32xf32>, vector<32x32xf32>, vector<2x32xf32> -> vector<2x32xf32>
    %169 = arith.addf %167, %168 : vector<2x32xf32>
    %170 = math.tanh %169 : vector<2x32xf32>
    %171 = vector.extract_strided_slice %147 {offsets = [3, 0, 0], sizes = [1, 2, 32], strides = [1, 1, 1]} : vector<4x2x32xf32> to vector<1x2x32xf32>
    %172 = vector.shape_cast %171 : vector<1x2x32xf32> to vector<2x32xf32>
    %cst_57 = arith.constant dense<0.000000e+00> : vector<2x32xf32>
    %173 = tpu.matmul %140, %10, %cst_57 {dimension_numbers = #tpu.dot_dimension_numbers<[1], [0], [0], [1], [0, 0, 1, 1], [], []>} : vector<2x32xf32>, vector<32x32xf32>, vector<2x32xf32> -> vector<2x32xf32>
    %174 = arith.addf %172, %173 : vector<2x32xf32>
    %175 = arith.negf %174 : vector<2x32xf32>
    %176 = math.exp %175 : vector<2x32xf32>
    %cst_58 = arith.constant 1.000000e+00 : f32
    %177 = vector.broadcast %cst_58 : f32 to vector<2x32xf32>
    %178 = arith.addf %177, %176 : vector<2x32xf32>
    %179 = arith.divf %177, %178 : vector<2x32xf32>
    %180 = arith.mulf %165, %138 : vector<2x32xf32>
    %181 = arith.mulf %156, %170 : vector<2x32xf32>
    %182 = arith.addf %180, %181 : vector<2x32xf32>
    %183 = math.tanh %182 : vector<2x32xf32>
    %184 = arith.mulf %179, %183 : vector<2x32xf32>
    %185 = arith.index_cast %c3_i32 : i32 to index
    %c0_59 = arith.constant 0 : index
    %c0_60 = arith.constant 0 : index
    %186 = vector.load %arg3[%185, %c0_59, %c0_60] : memref<8x2x32xf32, #tpu.memory_space<vmem>>, vector<1x2x32xf32>
    %187 = vector.shape_cast %186 : vector<1x2x32xf32> to vector<2x32xf32>
    %188 = vector.shape_cast %184 : vector<2x32xf32> to vector<1x2x32xf32>
    tpu.vector_store %arg3[%185, %c0_59, %c0_60], %188 {strides = array<i32>} : memref<8x2x32xf32, #tpu.memory_space<vmem>>, vector<1x2x32xf32>,
    %c4_i32 = arith.constant 4 : i32
    %189 = arith.index_cast %c4_i32 : i32 to index
    %c0_61 = arith.constant 0 : index
    %c0_62 = arith.constant 0 : index
    %c0_63 = arith.constant 0 : index
    %190 = vector.load %arg1[%189, %c0_61, %c0_62, %c0_63] : memref<8x4x2x32xf32, #tpu.memory_space<vmem>>, vector<1x4x2x32xf32>
    %191 = vector.shape_cast %190 : vector<1x4x2x32xf32> to vector<4x2x32xf32>
    %192 = vector.extract_strided_slice %191 {offsets = [0, 0, 0], sizes = [1, 2, 32], strides = [1, 1, 1]} : vector<4x2x32xf32> to vector<1x2x32xf32>
    %193 = vector.shape_cast %192 : vector<1x2x32xf32> to vector<2x32xf32>
    %cst_64 = arith.constant dense<0.000000e+00> : vector<2x32xf32>
    %194 = tpu.matmul %184, %4, %cst_64 {dimension_numbers = #tpu.dot_dimension_numbers<[1], [0], [0], [1], [0, 0, 1, 1], [], []>} : vector<2x32xf32>, vector<32x32xf32>, vector<2x32xf32> -> vector<2x32xf32>
    %195 = arith.addf %193, %194 : vector<2x32xf32>
    %196 = arith.negf %195 : vector<2x32xf32>
    %197 = math.exp %196 : vector<2x32xf32>
    %cst_65 = arith.constant 1.000000e+00 : f32
    %198 = vector.broadcast %cst_65 : f32 to vector<2x32xf32>
    %199 = arith.addf %198, %197 : vector<2x32xf32>
    %200 = arith.divf %198, %199 : vector<2x32xf32>
    %201 = vector.extract_strided_slice %191 {offsets = [1, 0, 0], sizes = [1, 2, 32], strides = [1, 1, 1]} : vector<4x2x32xf32> to vector<1x2x32xf32>
    %202 = vector.shape_cast %201 : vector<1x2x32xf32> to vector<2x32xf32>
    %cst_66 = arith.constant dense<0.000000e+00> : vector<2x32xf32>
    %203 = tpu.matmul %184, %6, %cst_66 {dimension_numbers = #tpu.dot_dimension_numbers<[1], [0], [0], [1], [0, 0, 1, 1], [], []>} : vector<2x32xf32>, vector<32x32xf32>, vector<2x32xf32> -> vector<2x32xf32>
    %204 = arith.addf %202, %203 : vector<2x32xf32>
    %205 = arith.negf %204 : vector<2x32xf32>
    %206 = math.exp %205 : vector<2x32xf32>
    %cst_67 = arith.constant 1.000000e+00 : f32
    %207 = vector.broadcast %cst_67 : f32 to vector<2x32xf32>
    %208 = arith.addf %207, %206 : vector<2x32xf32>
    %209 = arith.divf %207, %208 : vector<2x32xf32>
    %210 = vector.extract_strided_slice %191 {offsets = [2, 0, 0], sizes = [1, 2, 32], strides = [1, 1, 1]} : vector<4x2x32xf32> to vector<1x2x32xf32>
    %211 = vector.shape_cast %210 : vector<1x2x32xf32> to vector<2x32xf32>
    %cst_68 = arith.constant dense<0.000000e+00> : vector<2x32xf32>
    %212 = tpu.matmul %184, %8, %cst_68 {dimension_numbers = #tpu.dot_dimension_numbers<[1], [0], [0], [1], [0, 0, 1, 1], [], []>} : vector<2x32xf32>, vector<32x32xf32>, vector<2x32xf32> -> vector<2x32xf32>
    %213 = arith.addf %211, %212 : vector<2x32xf32>
    %214 = math.tanh %213 : vector<2x32xf32>
    %215 = vector.extract_strided_slice %191 {offsets = [3, 0, 0], sizes = [1, 2, 32], strides = [1, 1, 1]} : vector<4x2x32xf32> to vector<1x2x32xf32>
    %216 = vector.shape_cast %215 : vector<1x2x32xf32> to vector<2x32xf32>
    %cst_69 = arith.constant dense<0.000000e+00> : vector<2x32xf32>
    %217 = tpu.matmul %184, %10, %cst_69 {dimension_numbers = #tpu.dot_dimension_numbers<[1], [0], [0], [1], [0, 0, 1, 1], [], []>} : vector<2x32xf32>, vector<32x32xf32>, vector<2x32xf32> -> vector<2x32xf32>
    %218 = arith.addf %216, %217 : vector<2x32xf32>
    %219 = arith.negf %218 : vector<2x32xf32>
    %220 = math.exp %219 : vector<2x32xf32>
    %cst_70 = arith.constant 1.000000e+00 : f32
    %221 = vector.broadcast %cst_70 : f32 to vector<2x32xf32>
    %222 = arith.addf %221, %220 : vector<2x32xf32>
    %223 = arith.divf %221, %222 : vector<2x32xf32>
    %224 = arith.mulf %209, %182 : vector<2x32xf32>
    %225 = arith.mulf %200, %214 : vector<2x32xf32>
    %226 = arith.addf %224, %225 : vector<2x32xf32>
    %227 = math.tanh %226 : vector<2x32xf32>
    %228 = arith.mulf %223, %227 : vector<2x32xf32>
    %229 = arith.index_cast %c4_i32 : i32 to index
    %c0_71 = arith.constant 0 : index
    %c0_72 = arith.constant 0 : index
    %230 = vector.load %arg3[%229, %c0_71, %c0_72] : memref<8x2x32xf32, #tpu.memory_space<vmem>>, vector<1x2x32xf32>
    %231 = vector.shape_cast %230 : vector<1x2x32xf32> to vector<2x32xf32>
    %232 = vector.shape_cast %228 : vector<2x32xf32> to vector<1x2x32xf32>
    tpu.vector_store %arg3[%229, %c0_71, %c0_72], %232 {strides = array<i32>} : memref<8x2x32xf32, #tpu.memory_space<vmem>>, vector<1x2x32xf32>,
    %c5_i32 = arith.constant 5 : i32
    %233 = arith.index_cast %c5_i32 : i32 to index
    %c0_73 = arith.constant 0 : index
    %c0_74 = arith.constant 0 : index
    %c0_75 = arith.constant 0 : index
    %234 = vector.load %arg1[%233, %c0_73, %c0_74, %c0_75] : memref<8x4x2x32xf32, #tpu.memory_space<vmem>>, vector<1x4x2x32xf32>
    %235 = vector.shape_cast %234 : vector<1x4x2x32xf32> to vector<4x2x32xf32>
    %236 = vector.extract_strided_slice %235 {offsets = [0, 0, 0], sizes = [1, 2, 32], strides = [1, 1, 1]} : vector<4x2x32xf32> to vector<1x2x32xf32>
    %237 = vector.shape_cast %236 : vector<1x2x32xf32> to vector<2x32xf32>
    %cst_76 = arith.constant dense<0.000000e+00> : vector<2x32xf32>
    %238 = tpu.matmul %228, %4, %cst_76 {dimension_numbers = #tpu.dot_dimension_numbers<[1], [0], [0], [1], [0, 0, 1, 1], [], []>} : vector<2x32xf32>, vector<32x32xf32>, vector<2x32xf32> -> vector<2x32xf32>
    %239 = arith.addf %237, %238 : vector<2x32xf32>
    %240 = arith.negf %239 : vector<2x32xf32>
    %241 = math.exp %240 : vector<2x32xf32>
    %cst_77 = arith.constant 1.000000e+00 : f32
    %242 = vector.broadcast %cst_77 : f32 to vector<2x32xf32>
    %243 = arith.addf %242, %241 : vector<2x32xf32>
    %244 = arith.divf %242, %243 : vector<2x32xf32>
    %245 = vector.extract_strided_slice %235 {offsets = [1, 0, 0], sizes = [1, 2, 32], strides = [1, 1, 1]} : vector<4x2x32xf32> to vector<1x2x32xf32>
    %246 = vector.shape_cast %245 : vector<1x2x32xf32> to vector<2x32xf32>
    %cst_78 = arith.constant dense<0.000000e+00> : vector<2x32xf32>
    %247 = tpu.matmul %228, %6, %cst_78 {dimension_numbers = #tpu.dot_dimension_numbers<[1], [0], [0], [1], [0, 0, 1, 1], [], []>} : vector<2x32xf32>, vector<32x32xf32>, vector<2x32xf32> -> vector<2x32xf32>
    %248 = arith.addf %246, %247 : vector<2x32xf32>
    %249 = arith.negf %248 : vector<2x32xf32>
    %250 = math.exp %249 : vector<2x32xf32>
    %cst_79 = arith.constant 1.000000e+00 : f32
    %251 = vector.broadcast %cst_79 : f32 to vector<2x32xf32>
    %252 = arith.addf %251, %250 : vector<2x32xf32>
    %253 = arith.divf %251, %252 : vector<2x32xf32>
    %254 = vector.extract_strided_slice %235 {offsets = [2, 0, 0], sizes = [1, 2, 32], strides = [1, 1, 1]} : vector<4x2x32xf32> to vector<1x2x32xf32>
    %255 = vector.shape_cast %254 : vector<1x2x32xf32> to vector<2x32xf32>
    %cst_80 = arith.constant dense<0.000000e+00> : vector<2x32xf32>
    %256 = tpu.matmul %228, %8, %cst_80 {dimension_numbers = #tpu.dot_dimension_numbers<[1], [0], [0], [1], [0, 0, 1, 1], [], []>} : vector<2x32xf32>, vector<32x32xf32>, vector<2x32xf32> -> vector<2x32xf32>
    %257 = arith.addf %255, %256 : vector<2x32xf32>
    %258 = math.tanh %257 : vector<2x32xf32>
    %259 = vector.extract_strided_slice %235 {offsets = [3, 0, 0], sizes = [1, 2, 32], strides = [1, 1, 1]} : vector<4x2x32xf32> to vector<1x2x32xf32>
    %260 = vector.shape_cast %259 : vector<1x2x32xf32> to vector<2x32xf32>
    %cst_81 = arith.constant dense<0.000000e+00> : vector<2x32xf32>
    %261 = tpu.matmul %228, %10, %cst_81 {dimension_numbers = #tpu.dot_dimension_numbers<[1], [0], [0], [1], [0, 0, 1, 1], [], []>} : vector<2x32xf32>, vector<32x32xf32>, vector<2x32xf32> -> vector<2x32xf32>
    %262 = arith.addf %260, %261 : vector<2x32xf32>
    %263 = arith.negf %262 : vector<2x32xf32>
    %264 = math.exp %263 : vector<2x32xf32>
    %cst_82 = arith.constant 1.000000e+00 : f32
    %265 = vector.broadcast %cst_82 : f32 to vector<2x32xf32>
    %266 = arith.addf %265, %264 : vector<2x32xf32>
    %267 = arith.divf %265, %266 : vector<2x32xf32>
    %268 = arith.mulf %253, %226 : vector<2x32xf32>
    %269 = arith.mulf %244, %258 : vector<2x32xf32>
    %270 = arith.addf %268, %269 : vector<2x32xf32>
    %271 = math.tanh %270 : vector<2x32xf32>
    %272 = arith.mulf %267, %271 : vector<2x32xf32>
    %273 = arith.index_cast %c5_i32 : i32 to index
    %c0_83 = arith.constant 0 : index
    %c0_84 = arith.constant 0 : index
    %274 = vector.load %arg3[%273, %c0_83, %c0_84] : memref<8x2x32xf32, #tpu.memory_space<vmem>>, vector<1x2x32xf32>
    %275 = vector.shape_cast %274 : vector<1x2x32xf32> to vector<2x32xf32>
    %276 = vector.shape_cast %272 : vector<2x32xf32> to vector<1x2x32xf32>
    tpu.vector_store %arg3[%273, %c0_83, %c0_84], %276 {strides = array<i32>} : memref<8x2x32xf32, #tpu.memory_space<vmem>>, vector<1x2x32xf32>,
    %c6_i32 = arith.constant 6 : i32
    %277 = arith.index_cast %c6_i32 : i32 to index
    %c0_85 = arith.constant 0 : index
    %c0_86 = arith.constant 0 : index
    %c0_87 = arith.constant 0 : index
    %278 = vector.load %arg1[%277, %c0_85, %c0_86, %c0_87] : memref<8x4x2x32xf32, #tpu.memory_space<vmem>>, vector<1x4x2x32xf32>
    %279 = vector.shape_cast %278 : vector<1x4x2x32xf32> to vector<4x2x32xf32>
    %280 = vector.extract_strided_slice %279 {offsets = [0, 0, 0], sizes = [1, 2, 32], strides = [1, 1, 1]} : vector<4x2x32xf32> to vector<1x2x32xf32>
    %281 = vector.shape_cast %280 : vector<1x2x32xf32> to vector<2x32xf32>
    %cst_88 = arith.constant dense<0.000000e+00> : vector<2x32xf32>
    %282 = tpu.matmul %272, %4, %cst_88 {dimension_numbers = #tpu.dot_dimension_numbers<[1], [0], [0], [1], [0, 0, 1, 1], [], []>} : vector<2x32xf32>, vector<32x32xf32>, vector<2x32xf32> -> vector<2x32xf32>
    %283 = arith.addf %281, %282 : vector<2x32xf32>
    %284 = arith.negf %283 : vector<2x32xf32>
    %285 = math.exp %284 : vector<2x32xf32>
    %cst_89 = arith.constant 1.000000e+00 : f32
    %286 = vector.broadcast %cst_89 : f32 to vector<2x32xf32>
    %287 = arith.addf %286, %285 : vector<2x32xf32>
    %288 = arith.divf %286, %287 : vector<2x32xf32>
    %289 = vector.extract_strided_slice %279 {offsets = [1, 0, 0], sizes = [1, 2, 32], strides = [1, 1, 1]} : vector<4x2x32xf32> to vector<1x2x32xf32>
    %290 = vector.shape_cast %289 : vector<1x2x32xf32> to vector<2x32xf32>
    %cst_90 = arith.constant dense<0.000000e+00> : vector<2x32xf32>
    %291 = tpu.matmul %272, %6, %cst_90 {dimension_numbers = #tpu.dot_dimension_numbers<[1], [0], [0], [1], [0, 0, 1, 1], [], []>} : vector<2x32xf32>, vector<32x32xf32>, vector<2x32xf32> -> vector<2x32xf32>
    %292 = arith.addf %290, %291 : vector<2x32xf32>
    %293 = arith.negf %292 : vector<2x32xf32>
    %294 = math.exp %293 : vector<2x32xf32>
    %cst_91 = arith.constant 1.000000e+00 : f32
    %295 = vector.broadcast %cst_91 : f32 to vector<2x32xf32>
    %296 = arith.addf %295, %294 : vector<2x32xf32>
    %297 = arith.divf %295, %296 : vector<2x32xf32>
    %298 = vector.extract_strided_slice %279 {offsets = [2, 0, 0], sizes = [1, 2, 32], strides = [1, 1, 1]} : vector<4x2x32xf32> to vector<1x2x32xf32>
    %299 = vector.shape_cast %298 : vector<1x2x32xf32> to vector<2x32xf32>
    %cst_92 = arith.constant dense<0.000000e+00> : vector<2x32xf32>
    %300 = tpu.matmul %272, %8, %cst_92 {dimension_numbers = #tpu.dot_dimension_numbers<[1], [0], [0], [1], [0, 0, 1, 1], [], []>} : vector<2x32xf32>, vector<32x32xf32>, vector<2x32xf32> -> vector<2x32xf32>
    %301 = arith.addf %299, %300 : vector<2x32xf32>
    %302 = math.tanh %301 : vector<2x32xf32>
    %303 = vector.extract_strided_slice %279 {offsets = [3, 0, 0], sizes = [1, 2, 32], strides = [1, 1, 1]} : vector<4x2x32xf32> to vector<1x2x32xf32>
    %304 = vector.shape_cast %303 : vector<1x2x32xf32> to vector<2x32xf32>
    %cst_93 = arith.constant dense<0.000000e+00> : vector<2x32xf32>
    %305 = tpu.matmul %272, %10, %cst_93 {dimension_numbers = #tpu.dot_dimension_numbers<[1], [0], [0], [1], [0, 0, 1, 1], [], []>} : vector<2x32xf32>, vector<32x32xf32>, vector<2x32xf32> -> vector<2x32xf32>
    %306 = arith.addf %304, %305 : vector<2x32xf32>
    %307 = arith.negf %306 : vector<2x32xf32>
    %308 = math.exp %307 : vector<2x32xf32>
    %cst_94 = arith.constant 1.000000e+00 : f32
    %309 = vector.broadcast %cst_94 : f32 to vector<2x32xf32>
    %310 = arith.addf %309, %308 : vector<2x32xf32>
    %311 = arith.divf %309, %310 : vector<2x32xf32>
    %312 = arith.mulf %297, %270 : vector<2x32xf32>
    %313 = arith.mulf %288, %302 : vector<2x32xf32>
    %314 = arith.addf %312, %313 : vector<2x32xf32>
    %315 = math.tanh %314 : vector<2x32xf32>
    %316 = arith.mulf %311, %315 : vector<2x32xf32>
    %317 = arith.index_cast %c6_i32 : i32 to index
    %c0_95 = arith.constant 0 : index
    %c0_96 = arith.constant 0 : index
    %318 = vector.load %arg3[%317, %c0_95, %c0_96] : memref<8x2x32xf32, #tpu.memory_space<vmem>>, vector<1x2x32xf32>
    %319 = vector.shape_cast %318 : vector<1x2x32xf32> to vector<2x32xf32>
    %320 = vector.shape_cast %316 : vector<2x32xf32> to vector<1x2x32xf32>
    tpu.vector_store %arg3[%317, %c0_95, %c0_96], %320 {strides = array<i32>} : memref<8x2x32xf32, #tpu.memory_space<vmem>>, vector<1x2x32xf32>,
    %c7_i32 = arith.constant 7 : i32
    %321 = arith.index_cast %c7_i32 : i32 to index
    %c0_97 = arith.constant 0 : index
    %c0_98 = arith.constant 0 : index
    %c0_99 = arith.constant 0 : index
    %322 = vector.load %arg1[%321, %c0_97, %c0_98, %c0_99] : memref<8x4x2x32xf32, #tpu.memory_space<vmem>>, vector<1x4x2x32xf32>
    %323 = vector.shape_cast %322 : vector<1x4x2x32xf32> to vector<4x2x32xf32>
    %324 = vector.extract_strided_slice %323 {offsets = [0, 0, 0], sizes = [1, 2, 32], strides = [1, 1, 1]} : vector<4x2x32xf32> to vector<1x2x32xf32>
    %325 = vector.shape_cast %324 : vector<1x2x32xf32> to vector<2x32xf32>
    %cst_100 = arith.constant dense<0.000000e+00> : vector<2x32xf32>
    %326 = tpu.matmul %316, %4, %cst_100 {dimension_numbers = #tpu.dot_dimension_numbers<[1], [0], [0], [1], [0, 0, 1, 1], [], []>} : vector<2x32xf32>, vector<32x32xf32>, vector<2x32xf32> -> vector<2x32xf32>
    %327 = arith.addf %325, %326 : vector<2x32xf32>
    %328 = arith.negf %327 : vector<2x32xf32>
    %329 = math.exp %328 : vector<2x32xf32>
    %cst_101 = arith.constant 1.000000e+00 : f32
    %330 = vector.broadcast %cst_101 : f32 to vector<2x32xf32>
    %331 = arith.addf %330, %329 : vector<2x32xf32>
    %332 = arith.divf %330, %331 : vector<2x32xf32>
    %333 = vector.extract_strided_slice %323 {offsets = [1, 0, 0], sizes = [1, 2, 32], strides = [1, 1, 1]} : vector<4x2x32xf32> to vector<1x2x32xf32>
    %334 = vector.shape_cast %333 : vector<1x2x32xf32> to vector<2x32xf32>
    %cst_102 = arith.constant dense<0.000000e+00> : vector<2x32xf32>
    %335 = tpu.matmul %316, %6, %cst_102 {dimension_numbers = #tpu.dot_dimension_numbers<[1], [0], [0], [1], [0, 0, 1, 1], [], []>} : vector<2x32xf32>, vector<32x32xf32>, vector<2x32xf32> -> vector<2x32xf32>
    %336 = arith.addf %334, %335 : vector<2x32xf32>
    %337 = arith.negf %336 : vector<2x32xf32>
    %338 = math.exp %337 : vector<2x32xf32>
    %cst_103 = arith.constant 1.000000e+00 : f32
    %339 = vector.broadcast %cst_103 : f32 to vector<2x32xf32>
    %340 = arith.addf %339, %338 : vector<2x32xf32>
    %341 = arith.divf %339, %340 : vector<2x32xf32>
    %342 = vector.extract_strided_slice %323 {offsets = [2, 0, 0], sizes = [1, 2, 32], strides = [1, 1, 1]} : vector<4x2x32xf32> to vector<1x2x32xf32>
    %343 = vector.shape_cast %342 : vector<1x2x32xf32> to vector<2x32xf32>
    %cst_104 = arith.constant dense<0.000000e+00> : vector<2x32xf32>
    %344 = tpu.matmul %316, %8, %cst_104 {dimension_numbers = #tpu.dot_dimension_numbers<[1], [0], [0], [1], [0, 0, 1, 1], [], []>} : vector<2x32xf32>, vector<32x32xf32>, vector<2x32xf32> -> vector<2x32xf32>
    %345 = arith.addf %343, %344 : vector<2x32xf32>
    %346 = math.tanh %345 : vector<2x32xf32>
    %347 = vector.extract_strided_slice %323 {offsets = [3, 0, 0], sizes = [1, 2, 32], strides = [1, 1, 1]} : vector<4x2x32xf32> to vector<1x2x32xf32>
    %348 = vector.shape_cast %347 : vector<1x2x32xf32> to vector<2x32xf32>
    %cst_105 = arith.constant dense<0.000000e+00> : vector<2x32xf32>
    %349 = tpu.matmul %316, %10, %cst_105 {dimension_numbers = #tpu.dot_dimension_numbers<[1], [0], [0], [1], [0, 0, 1, 1], [], []>} : vector<2x32xf32>, vector<32x32xf32>, vector<2x32xf32> -> vector<2x32xf32>
    %350 = arith.addf %348, %349 : vector<2x32xf32>
    %351 = arith.negf %350 : vector<2x32xf32>
    %352 = math.exp %351 : vector<2x32xf32>
    %cst_106 = arith.constant 1.000000e+00 : f32
    %353 = vector.broadcast %cst_106 : f32 to vector<2x32xf32>
    %354 = arith.addf %353, %352 : vector<2x32xf32>
    %355 = arith.divf %353, %354 : vector<2x32xf32>
    %356 = arith.mulf %341, %314 : vector<2x32xf32>
    %357 = arith.mulf %332, %346 : vector<2x32xf32>
    %358 = arith.addf %356, %357 : vector<2x32xf32>
    %359 = math.tanh %358 : vector<2x32xf32>
    %360 = arith.mulf %355, %359 : vector<2x32xf32>
    %361 = arith.index_cast %c7_i32 : i32 to index
    %c0_107 = arith.constant 0 : index
    %c0_108 = arith.constant 0 : index
    %362 = vector.load %arg3[%361, %c0_107, %c0_108] : memref<8x2x32xf32, #tpu.memory_space<vmem>>, vector<1x2x32xf32>
    %363 = vector.shape_cast %362 : vector<1x2x32xf32> to vector<2x32xf32>
    %364 = vector.shape_cast %360 : vector<2x32xf32> to vector<1x2x32xf32>
    tpu.vector_store %arg3[%361, %c0_107, %c0_108], %364 {strides = array<i32>} : memref<8x2x32xf32, #tpu.memory_space<vmem>>, vector<1x2x32xf32>,
    %c8_i32 = arith.constant 8 : i32
    %c0_109 = arith.constant 0 : index
    %c0_110 = arith.constant 0 : index
    %365 = vector.load %arg4[%c0_109, %c0_110] : memref<2x32xf32, #tpu.memory_space<vmem>>, vector<2x32xf32>
    tpu.vector_store %arg4[%c0_109, %c0_110], %360 {strides = array<i32>} : memref<2x32xf32, #tpu.memory_space<vmem>>, vector<2x32xf32>,
    %c0_111 = arith.constant 0 : index
    %c0_112 = arith.constant 0 : index
    %366 = vector.load %arg5[%c0_111, %c0_112] : memref<2x32xf32, #tpu.memory_space<vmem>>, vector<2x32xf32>
    tpu.vector_store %arg5[%c0_111, %c0_112], %358 {strides = array<i32>} : memref<2x32xf32, #tpu.memory_space<vmem>>, vector<2x32xf32>,
    return
  }
  func.func @transform_0(%arg0: i32) -> (i32, i32, i32, i32) {
    %c0_i32 = arith.constant 0 : i32
    %c0_i32_0 = arith.constant 0 : i32
    %c0_i32_1 = arith.constant 0 : i32
    %c0_i32_2 = arith.constant 0 : i32
    return %arg0, %c0_i32, %c0_i32_0, %c0_i32_1 : i32, i32, i32, i32
  }
  func.func @transform_1(%arg0: i32) -> (i32, i32, i32) {
    %c0_i32 = arith.constant 0 : i32
    %c0_i32_0 = arith.constant 0 : i32
    %c0_i32_1 = arith.constant 0 : i32
    %c0_i32_2 = arith.constant 0 : i32
    return %c0_i32, %c0_i32_0, %c0_i32_1 : i32, i32, i32
  }
  func.func @transform_2(%arg0: i32) -> (i32, i32, i32) {
    %c0_i32 = arith.constant 0 : i32
    %c0_i32_0 = arith.constant 0 : i32
    %c0_i32_1 = arith.constant 0 : i32
    return %arg0, %c0_i32, %c0_i32_0 : i32, i32, i32
  }
}

</mosaic_0001>

<bundles_post_ra>
// kernel: lstm_lm_forward.5
= control target key start
LH: loop header
LB: loop body
LE: loop exit
PB: predicated region body
PF: predicated region fallthrough
CT: control target
= control target key end

     0   :  { %vm18_vm0 = vcmask 523264   ;;  %v89_v2 = vmov 0.0   ;;  %vm29_vm1 = vcmask 261120   ;;  %s143_s1 = inlined_call_operand.vmem [shape: f32[32,64], index: 1, kind: input, shape index: {}]   ;;  %s144_s2 = inlined_call_operand.vmem [shape: f32[1,64], index: 2, kind: input, shape index: {}]   ;;  %s145_s0 = inlined_call_operand.vmem [shape: f32[16,32], index: 0, kind: input, shape index: {}]   ;;  %s146_s3 = inlined_call_operand.vmem [shape: f32[16,64], index: 3, kind: output, shape index: {}]  }
   0x1   :  { %v28_v0 = vld [vmem:[%s143_s1 + $0x18] sm:$0xff]  ;;  %v27_v1 = vld [vmem:[%s143_s1 + $0x10] sm:$0xff]  ;;  %19 = vst.msk [vmem:[#allocation2] sm:$0xff] %vm18_vm0, %v89_v2  ;;  %v26_v3 = vld [vmem:[%s143_s1 + $0x8] sm:$0xff] }
   0x2   :  { %48 = vmatpush.msra.mxu0 %v28_v0  ;;  %83 = vmatpush.msra.mxu1 %v28_v0  ;;  %20 = vst.msk [vmem:[#allocation2 + $0x8] sm:$0xff] %vm18_vm0, %v89_v2  ;;  %v25_v4 = vld [vmem:[%s143_s1] sm:$0xff]  ;;  %v24_v6 = vld [vmem:[%s145_s0 + $0x8] sm:$0xff] }
   0x3   :  { %v23_v5 = vld [vmem:[%s145_s0] sm:$0xff] }
   0x4   :  { %49 = vmatpush.msra.mxu0 %v27_v1  ;;  %84 = vmatpush.msra.mxu1 %v27_v1  ;;  %v88_v13 = vld [vmem:[%s144_s2] ss:$0 sm:$0xff] }
   0x6   :  { %50 = vmatpush.msra.mxu0 %v26_v3  ;;  %85 = vmatpush.msra.mxu1 %v26_v3 }
   0x8   :  { %51 = vmatpush.msra.mxu0 %v25_v4  ;;  %86 = vmatpush.msra.mxu1 %v25_v4  ;;  %v21_v7 = vld [vmem:[#allocation2] sm:$0xff] }
   0x9   :  { %81 = vmatmul.msk.f32.vlgmr.msra.gmra.mxu0 %vm29_vm1, %v23_v5  ;;  %82 = vmatmul.msk.f32.vlgmr.msra.gmra.mxu1 %vm29_vm1, %v24_v6  ;;  %v22_v8 = vld [vmem:[#allocation2 + $0x8] sm:$0xff] }
  0x86   :  { %v53_v9 = vpop.f32.mrf.mxu0  ;;  %v56_v10 = vpop.f32.mrf.mxu1 }
  0x87   :  { %v59_v11 = vadd.f32 %v53_v9, %v21_v7  ;;  %v60_v12 = vadd.f32 %v56_v10, %v22_v8 }
  0x89   :  { %62 = vst.msk [vmem:[#allocation2] sm:$0xff] %vm18_vm0, %v59_v11 }
  0x8a   :  { %63 = vst.msk [vmem:[#allocation2 + $0x8] sm:$0xff] %vm18_vm0, %v60_v12 }
  0x90   :  { %v67_v14 = vld [vmem:[#allocation2] sm:$0xff] }
  0x91   :  { %v73_v15 = vadd.f32 %v88_v13, %v67_v14  ;;  %v68_v16 = vld [vmem:[#allocation2 + $0x8] sm:$0xff] }
  0x92   :  { %v74_v17 = vadd.f32 %v88_v13, %v68_v16 }
  0x93   :  { %75 = vst.msk [vmem:[%s146_s3] sm:$0xff] %vm18_vm0, %v73_v15 }
  0x94   :  { %76 = vst.msk [vmem:[%s146_s3 + $0x8] sm:$0xff] %vm18_vm0, %v74_v17 }

// kernel: lstm_lm_forward.3
= control target key start
LH: loop header
LB: loop body
LE: loop exit
PB: predicated region body
PF: predicated region fallthrough
CT: control target
= control target key end

     0   :  { %vm28_vm0 = vcmask 261120   ;;  %s133_s1 = inlined_call_operand.vmem [shape: f32[32,128], index: 1, kind: input, shape index: {}]   ;;  %s134_s2 = inlined_call_operand.vmem [shape: f32[1,128], index: 2, kind: input, shape index: {}]   ;;  %s135_s0 = inlined_call_operand.vmem [shape: f32[16,32], index: 0, kind: input, shape index: {}]   ;;  %s136_s3 = inlined_call_operand.vmem [shape: f32[16,128], index: 3, kind: output, shape index: {}]  }
   0x1   :  { %v27_v0 = vld [vmem:[%s133_s1 + $0x18] sm:$0xff]  ;;  %v26_v1 = vld [vmem:[%s133_s1 + $0x10] sm:$0xff]  ;;  %v25_v2 = vld [vmem:[%s133_s1 + $0x8] sm:$0xff] }
   0x2   :  { %47 = vmatpush.msra.mxu0 %v27_v0  ;;  %81 = vmatpush.msra.mxu1 %v27_v0  ;;  %v24_v3 = vld [vmem:[%s133_s1] sm:$0xff]  ;;  %v23_v5 = vld [vmem:[%s135_s0 + $0x8] sm:$0xff] }
   0x3   :  { %v22_v4 = vld [vmem:[%s135_s0] sm:$0xff] }
   0x4   :  { %48 = vmatpush.msra.mxu0 %v26_v1  ;;  %82 = vmatpush.msra.mxu1 %v26_v1  ;;  %v85_v6 = vld [vmem:[%s134_s2] ss:$0 sm:$0xff] }
   0x6   :  { %49 = vmatpush.msra.mxu0 %v25_v2  ;;  %83 = vmatpush.msra.mxu1 %v25_v2 }
   0x8   :  { %50 = vmatpush.msra.mxu0 %v24_v3  ;;  %84 = vmatpush.msra.mxu1 %v24_v3 }
   0x9   :  { %79 = vmatmul.msk.f32.vlgmr.msra.gmra.mxu0 %vm28_vm0, %v22_v4  ;;  %80 = vmatmul.msk.f32.vlgmr.msra.gmra.mxu1 %vm28_vm0, %v23_v5 }
  0x86   :  { %v52_v7 = vpop.f32.mrf.mxu0  ;;  %v55_v8 = vpop.f32.mrf.mxu1 }
  0x87   :  { %v71_v9 = vadd.f32 %v85_v6, %v52_v7  ;;  %v72_v10 = vadd.f32 %v85_v6, %v55_v8 }
  0x89   :  { %73 = vst [vmem:[%s136_s3] sm:$0xff] %v71_v9 }
  0x8a   :  { %74 = vst [vmem:[%s136_s3 + $0x8] sm:$0xff] %v72_v10 }

// kernel: lstm_lm_forward.4
= control target key start
LH: loop header
LB: loop body
LE: loop exit
PB: predicated region body
PF: predicated region fallthrough
CT: control target
= control target key end

     0   :  { %vm15_vm0 = vcmask 254976   ;;  %v1549_v3 = vmov 0.0   ;;  %vm43_vm1 = vcmask 261120   ;;  %s1997_s1 = inlined_call_operand.vmem [shape: f32[4,32,32], index: 1, kind: input, shape index: {}]   ;;  %s1998_s0 = inlined_call_operand.vmem [shape: f32[8,4,2,32], index: 0, kind: input, shape index: {}]   ;;  %s1999_s2 = inlined_call_operand.vmem [shape: f32[8,2,32], index: 2, kind: output, shape index: {}]  }
   0x1   :  { %v1568_v0 = vld [vmem:[%s1997_s1 + $0x18] sm:$0xff]  ;;  %16 = vst.msk [vmem:[#allocation2] sm:$0x3] %vm15_vm0, %v1549_v3  ;;  %v1586_v4 = vld [vmem:[%s1997_s1 + $0x10] sm:$0xff]  ;;  %v1603_v7 = vld [vmem:[%s1997_s1 + $0x8] sm:$0xff] }
   0x2   :  { %v1573_v1 = vld [vmem:[%s1997_s1 + $0x38] sm:$0xff]  ;;  %59 = vmatpush.msra.mxu0 %v1568_v0  ;;  %v1591_v5 = vld [vmem:[%s1997_s1 + $0x30] sm:$0xff]  ;;  %17 = vst.msk [vmem:[#allocation3] sm:$0x3] %vm15_vm0, %v1549_v3  ;;  %v1608_v8 = vld [vmem:[%s1997_s1 + $0x28] sm:$0xff] }
   0x3   :  { %v1578_v2 = vld [vmem:[%s1997_s1 + $0x78] sm:$0xff]  ;;  %99 = vmatpush.msra.mxu1 %v1573_v1  ;;  %v1596_v6 = vld [vmem:[%s1997_s1 + $0x70] sm:$0xff]  ;;  %v1615_v9 = vld [vmem:[%s1997_s1 + $0x68] sm:$0xff] }
   0x4   :  { %161 = vmatpush.msra.mxu3 %v1578_v2  ;;  %60 = vmatpush.msra.mxu0 %v1586_v4  ;;  %v1621_v10 = vld [vmem:[%s1997_s1] sm:$0xff]  ;;  %v1631_v12 = vld [vmem:[%s1997_s1 + $0x58] sm:$0xff]  ;;  %v1647_v15 = vld [vmem:[%s1997_s1 + $0x50] sm:$0xff] }
   0x5   :  { %100 = vmatpush.msra.mxu1 %v1591_v5  ;;  %v1626_v11 = vld [vmem:[%s1997_s1 + $0x20] sm:$0xff]  ;;  %139 = vmatpush.msra.mxu2 %v1631_v12  ;;  %v1656_v16 = vld [vmem:[%s1997_s1 + $0x48] sm:$0xff] }
   0x6   :  { %162 = vmatpush.msra.mxu3 %v1596_v6  ;;  %61 = vmatpush.msra.mxu0 %v1603_v7  ;;  %v1638_v13 = vld [vmem:[%s1997_s1 + $0x60] sm:$0xff] }
   0x7   :  { %101 = vmatpush.msra.mxu1 %v1608_v8  ;;  %140 = vmatpush.msra.mxu2 %v1647_v15  ;;  %v1663_v17 = vld [vmem:[%s1997_s1 + $0x40] sm:$0xff] }
   0x8   :  { %163 = vmatpush.msra.mxu3 %v1615_v9  ;;  %62 = vmatpush.msra.mxu0 %v1621_v10  ;;  %v37_v14 = vld [vmem:[#allocation2] sm:$0x3]  ;;  %v40_v19 = vld [vmem:[%s1998_s0 + $0x2] sm:$0x3]  ;;  %v42_v26 = vld [vmem:[%s1998_s0 + $0x6] sm:$0x3] }
   0x9   :  { %102 = vmatpush.msra.mxu1 %v1626_v11  ;;  %1313 = vmatmul.msk.f32.vlgmr.msra.gmra.mxu0 %vm43_vm1, %v37_v14  ;;  %v39_v18 = vld [vmem:[%s1998_s0] sm:$0x3]  ;;  %v41_v34 = vld [vmem:[%s1998_s0 + $0x4] sm:$0x3]  ;;  %v38_v58 = vld [vmem:[#allocation3] sm:$0x3] }
   0xa   :  { %164 = vmatpush.msra.mxu3 %v1638_v13  ;;  %1315 = vmatmul.msk.f32.vlgmr.msra.gmra.mxu1 %vm43_vm1, %v37_v14 }
   0xb   :  { %1318 = vmatmul.msk.f32.vlgmr.msra.gmra.mxu3 %vm43_vm1, %v37_v14  ;;  %216 = vmatpush.msrb.mxu0 %v1568_v0 }
   0xc   :  { %256 = vmatpush.msrb.mxu1 %v1573_v1  ;;  %318 = vmatpush.msrb.mxu3 %v1578_v2 }
   0xd   :  { %141 = vmatpush.msra.mxu2 %v1656_v16  ;;  %217 = vmatpush.msrb.mxu0 %v1586_v4 }
   0xe   :  { %257 = vmatpush.msrb.mxu1 %v1591_v5  ;;  %319 = vmatpush.msrb.mxu3 %v1596_v6 }
   0xf   :  { %142 = vmatpush.msra.mxu2 %v1663_v17  ;;  %218 = vmatpush.msrb.mxu0 %v1603_v7 }
  0x10   :  { %1317 = vmatmul.msk.f32.vlgmr.msra.gmra.mxu2 %vm43_vm1, %v37_v14  ;;  %258 = vmatpush.msrb.mxu1 %v1608_v8 }
  0x11   :  { %296 = vmatpush.msrb.mxu2 %v1631_v12  ;;  %320 = vmatpush.msrb.mxu3 %v1615_v9 }
  0x12   :  { %219 = vmatpush.msrb.mxu0 %v1621_v10  ;;  %259 = vmatpush.msrb.mxu1 %v1626_v11 }
  0x13   :  { %297 = vmatpush.msrb.mxu2 %v1647_v15  ;;  %321 = vmatpush.msrb.mxu3 %v1638_v13 }
  0x14   :  { %373 = vmatpush.msra.mxu0 %v1568_v0  ;;  %413 = vmatpush.msra.mxu1 %v1573_v1 }
  0x15   :  { %298 = vmatpush.msrb.mxu2 %v1656_v16  ;;  %475 = vmatpush.msra.mxu3 %v1578_v2 }
  0x16   :  { %374 = vmatpush.msra.mxu0 %v1586_v4  ;;  %414 = vmatpush.msra.mxu1 %v1591_v5 }
  0x17   :  { %299 = vmatpush.msrb.mxu2 %v1663_v17  ;;  %476 = vmatpush.msra.mxu3 %v1596_v6 }
  0x18   :  { %375 = vmatpush.msra.mxu0 %v1603_v7  ;;  %415 = vmatpush.msra.mxu1 %v1608_v8 }
  0x19   :  { %453 = vmatpush.msra.mxu2 %v1631_v12  ;;  %477 = vmatpush.msra.mxu3 %v1615_v9 }
  0x1a   :  { %376 = vmatpush.msra.mxu0 %v1621_v10  ;;  %416 = vmatpush.msra.mxu1 %v1626_v11 }
  0x1b   :  { %454 = vmatpush.msra.mxu2 %v1647_v15  ;;  %478 = vmatpush.msra.mxu3 %v1638_v13 }
  0x1d   :  { %455 = vmatpush.msra.mxu2 %v1656_v16 }
  0x1f   :  { %456 = vmatpush.msra.mxu2 %v1663_v17 }
  0x86   :  { %v64_v20 = vpop.f32.mrf.mxu0 }
  0x87   :  { %v67_v21 = vadd.f32 %v64_v20, %v39_v18  ;;  %v104_v22 = vpop.f32.mrf.mxu1 }
  0x88   :  { %v107_v23 = vadd.f32 %v104_v22, %v40_v19 }
  0x89   :  { %v1314_v24 = vmul.f32 -1.442695, %v67_v21 }
  0x8a   :  { %v1316_v25 = vmul.f32 -1.442695, %v107_v23 }
  0x8b   :  { %1405 = vpow2.f32 %v1314_v24 }
  0x8c   :  { %1407 = vpow2.f32 %v1316_v25 }
  0x8e   :  { %v166_v27 = vpop.f32.mrf.mxu3 }
  0x8f   :  { %v169_v28 = vadd.f32 %v166_v27, %v42_v26 }
  0x91   :  { %v1319_v29 = vmul.f32 -1.442695, %v169_v28  ;;  %v1406_v30 = vpop.eup %1405  ;;  %v1320_v28 = vld [vmem:[%s1998_s0 + $0x8] sm:$0x3] }
  0x92   :  { %v1408_v31 = vpop.eup %1407  ;;  %v71_v32 = vadd.f32 1.0, %v1406_v30 }
  0x93   :  { %1409 = vpow2.f32 %v1319_v29  ;;  %v111_v33 = vadd.f32 1.0, %v1408_v31  ;;  %v144_v35 = vpop.f32.mrf.mxu2  ;;  %v1321_v29 = vld [vmem:[%s1998_s0 + $0xa] sm:$0x3] }
  0x94   :  { %1411 = vrcp.f32 %v71_v32  ;;  %v147_v37 = vadd.f32 %v144_v35, %v41_v34  ;;  %v83_v45 = vand.u32 2147483648, %v71_v32  ;;  %v81_v48 = vand.u32 2147483647, %v71_v32 }
  0x95   :  { %1413 = vrcp.f32 %v111_v33  ;;  %v123_v46 = vand.u32 2147483648, %v111_v33  ;;  %v121_v50 = vand.u32 2147483647, %v111_v33  ;;  %vm77_vm4 = vweird.f32 %v71_v32 }
  0x96   :  { %vm117_vm5 = vweird.f32 %v111_v33  ;;  %v84_v55 = vor.u32 1.1754944e-38, %v83_v45  ;;  %vm82_vm8 = vcmp.eq.f32.partialorder %v81_v48, 8.507059e+37 }
  0x97   :  { %v124_v57 = vor.u32 1.1754944e-38, %v123_v46  ;;  %vm122_vm9 = vcmp.eq.f32.partialorder %v121_v50, 8.507059e+37 }
  0x99   :  { %v1410_v36 = vpop.eup %1409 }
  0x9a   :  { %v173_v38 = vadd.f32 1.0, %v1410_v36  ;;  %v1412_v39 = vpop.eup %1411  ;;  %v1323_v36 = vld [vmem:[%s1998_s0 + $0xe] sm:$0x3] }
  0x9b   :  { %v1414_v40 = vpop.eup %1413  ;;  %v73_v41 = vmul.f32 %v1412_v39, %v71_v32  ;;  %vm78_vm2 = vweird.f32 %v1412_v39 }
  0x9c   :  { %1415 = vrcp.f32 %v173_v38  ;;  %v113_v42 = vmul.f32 %v1414_v40, %v111_v33  ;;  %vm118_vm3 = vweird.f32 %v1414_v40  ;;  %vm79_vm6 = vmor %vm77_vm4, %vm78_vm2  ;;  %v185_v21 = vand.u32 2147483648, %v173_v38 }
  0x9d   :  { %1417 = vtanh.f32 %v147_v37  ;;  %v74_v43 = vsub.f32 1.0, %v73_v41  ;;  %vm119_vm7 = vmor %vm117_vm5, %vm118_vm3  ;;  %vm179_vm11 = vweird.f32 %v173_v38  ;;  %v183_v22 = vand.u32 2147483647, %v173_v38 }
  0x9e   :  { %v114_v44 = vsub.f32 1.0, %v113_v42  ;;  %v186_v24 = vor.u32 1.1754944e-38, %v185_v21 }
  0x9f   :  { %v75_v47 = vmul.f32 %v1412_v39, %v74_v43  ;;  %vm184_vm13 = vcmp.eq.f32.partialorder %v183_v22, 8.507059e+37 }
  0xa0   :  { %v115_v49 = vmul.f32 %v1414_v40, %v114_v44  ;;  %v1322_v44 = vld [vmem:[%s1998_s0 + $0xc] sm:$0x3] }
  0xa1   :  { %v76_v52 = vadd.f32 %v1412_v39, %v75_v47 }
  0xa2   :  { %v1416_v51 = vpop.eup %1415  ;;  %v116_v56 = vadd.f32 %v1414_v40, %v115_v49 }
  0xa3   :  { %v1418_v53 = vpop.eup %1417  ;;  %v175_v54 = vmul.f32 %v1416_v51, %v173_v38  ;;  %v80_v59 = vsel %vm79_vm6, %v1412_v39, %v76_v52  ;;  %vm180_vm10 = vweird.f32 %v1416_v51 }
  0xa4   :  { %v85_v61 = vsel %vm82_vm8, %v84_v55, %v80_v59  ;;  %v120_v62 = vsel %vm119_vm7, %v1414_v40, %v116_v56  ;;  %vm181_vm12 = vmor %vm179_vm11, %vm180_vm10 }
  0xa5   :  { %v176_v60 = vsub.f32 1.0, %v175_v54  ;;  %v125_v63 = vsel %vm122_vm9, %v124_v57, %v120_v62  ;;  %v190_v3 = vmul.f32 %v1418_v53, %v85_v61 }
  0xa6   :  { %v189_v18 = vmul.f32 %v125_v63, %v38_v58 }
  0xa7   :  { %v177_v14 = vmul.f32 %v1416_v51, %v176_v60 }
  0xa8   :  { %v1711_v19 = vadd.f32 %v190_v3, %v189_v18 }
  0xa9   :  { %v178_v20 = vadd.f32 %v1416_v51, %v177_v14 }
  0xaa   :  { %1419 = vtanh.f32 %v1711_v19 }
  0xab   :  { %v182_v23 = vsel %vm181_vm12, %v1416_v51, %v178_v20 }
  0xac   :  { %v187_v26 = vsel %vm184_vm13, %v186_v24, %v182_v23 }
  0xb0   :  { %v1420_v25 = vpop.eup %1419 }
  0xb1   :  { %v193_v27 = vmul.f32 %v1420_v25, %v187_v26 }
  0xb3   :  { %195 = vst.msk [vmem:[%s1999_s2] sm:$0x3] %vm15_vm0, %v193_v27  ;;  %1324 = vmatmul.msk.f32.vlgmr.msrb.gmra.mxu0 %vm43_vm1, %v193_v27  ;;  %1326 = vmatmul.msk.f32.vlgmr.msrb.gmra.mxu1 %vm43_vm1, %v193_v27 }
  0xb4   :  { %1328 = vmatmul.msk.f32.vlgmr.msrb.gmra.mxu2 %vm43_vm1, %v193_v27  ;;  %1329 = vmatmul.msk.f32.vlgmr.msrb.gmra.mxu3 %vm43_vm1, %v193_v27 }
  0xb5   :  { %530 = vmatpush.msrb.mxu0 %v1568_v0  ;;  %570 = vmatpush.msrb.mxu1 %v1573_v1 }
  0xb6   :  { %610 = vmatpush.msrb.mxu2 %v1631_v12  ;;  %632 = vmatpush.msrb.mxu3 %v1578_v2 }
  0xb7   :  { %531 = vmatpush.msrb.mxu0 %v1586_v4  ;;  %571 = vmatpush.msrb.mxu1 %v1591_v5 }
  0xb8   :  { %611 = vmatpush.msrb.mxu2 %v1647_v15  ;;  %633 = vmatpush.msrb.mxu3 %v1596_v6 }
  0xb9   :  { %532 = vmatpush.msrb.mxu0 %v1603_v7  ;;  %572 = vmatpush.msrb.mxu1 %v1608_v8 }
  0xba   :  { %612 = vmatpush.msrb.mxu2 %v1656_v16  ;;  %634 = vmatpush.msrb.mxu3 %v1615_v9 }
  0xbb   :  { %533 = vmatpush.msrb.mxu0 %v1621_v10  ;;  %573 = vmatpush.msrb.mxu1 %v1626_v11 }
  0xbc   :  { %613 = vmatpush.msrb.mxu2 %v1663_v17  ;;  %635 = vmatpush.msrb.mxu3 %v1638_v13 }
 0x130   :  { %v221_v30 = vpop.f32.mrf.mxu0  ;;  %v261_v31 = vpop.f32.mrf.mxu1 }
 0x131   :  { %v224_v32 = vadd.f32 %v1320_v28, %v221_v30  ;;  %v264_v33 = vadd.f32 %v1321_v29, %v261_v31 }
 0x133   :  { %v1325_v34 = vmul.f32 -1.442695, %v224_v32  ;;  %v1327_v35 = vmul.f32 -1.442695, %v264_v33 }
 0x135   :  { %1421 = vpow2.f32 %v1325_v34 }
 0x136   :  { %1423 = vpow2.f32 %v1327_v35 }
 0x137   :  { %v323_v37 = vpop.f32.mrf.mxu3  ;;  %v301_v45 = vpop.f32.mrf.mxu2 }
 0x138   :  { %v326_v38 = vadd.f32 %v1323_v36, %v323_v37  ;;  %v304_v49 = vadd.f32 %v1322_v44, %v301_v45  ;;  %v1335_v45 = vld [vmem:[%s1998_s0 + $0x16] sm:$0x3] }
 0x13a   :  { %v1330_v39 = vmul.f32 -1.442695, %v326_v38  ;;  %v1333_v38 = vld [vmem:[%s1998_s0 + $0x12] sm:$0x3] }
 0x13b   :  { %v1422_v40 = vpop.eup %1421 }
 0x13c   :  { %v1424_v41 = vpop.eup %1423  ;;  %v228_v42 = vadd.f32 1.0, %v1422_v40  ;;  %1425 = vpow2.f32 %v1330_v39 }
 0x13d   :  { %v268_v43 = vadd.f32 1.0, %v1424_v41 }
 0x13e   :  { %1427 = vrcp.f32 %v228_v42  ;;  %v240_v55 = vand.u32 2147483648, %v228_v42  ;;  %v238_v58 = vand.u32 2147483647, %v228_v42  ;;  %vm234_vm2 = vweird.f32 %v228_v42 }
 0x13f   :  { %1429 = vrcp.f32 %v268_v43  ;;  %v280_v56 = vand.u32 2147483648, %v268_v43  ;;  %v278_v60 = vand.u32 2147483647, %v268_v43  ;;  %vm274_vm3 = vweird.f32 %v268_v43 }
 0x140   :  { %v241_v63 = vor.u32 1.1754944e-38, %v240_v55  ;;  %vm239_vm6 = vcmp.eq.f32.partialorder %v238_v58, 8.507059e+37 }
 0x141   :  { %v281_v18 = vor.u32 1.1754944e-38, %v280_v56  ;;  %vm279_vm7 = vcmp.eq.f32.partialorder %v278_v60, 8.507059e+37 }
 0x142   :  { %v1426_v46 = vpop.eup %1425 }
 0x143   :  { %v330_v47 = vadd.f32 1.0, %v1426_v46 }
 0x144   :  { %v1428_v48 = vpop.eup %1427 }
 0x145   :  { %v1430_v50 = vpop.eup %1429  ;;  %v230_v51 = vmul.f32 %v1428_v48, %v228_v42  ;;  %1431 = vrcp.f32 %v330_v47  ;;  %vm235_vm14 = vweird.f32 %v1428_v48  ;;  %v342_v31 = vand.u32 2147483648, %v330_v47 }
 0x146   :  { %v270_v52 = vmul.f32 %v1430_v50, %v268_v43  ;;  %1433 = vtanh.f32 %v304_v49  ;;  %vm275_vm15 = vweird.f32 %v1430_v50  ;;  %vm236_vm4 = vmor %vm234_vm2, %vm235_vm14  ;;  %vm336_vm9 = vweird.f32 %v330_v47 }
 0x147   :  { %v231_v53 = vsub.f32 1.0, %v230_v51  ;;  %vm276_vm5 = vmor %vm274_vm3, %vm275_vm15  ;;  %v340_v32 = vand.u32 2147483647, %v330_v47  ;;  %v343_v34 = vor.u32 1.1754944e-38, %v342_v31 }
 0x148   :  { %v271_v54 = vsub.f32 1.0, %v270_v52 }
 0x149   :  { %v232_v57 = vmul.f32 %v1428_v48, %v231_v53  ;;  %vm341_vm11 = vcmp.eq.f32.partialorder %v340_v32, 8.507059e+37  ;;  %v1334_v53 = vld [vmem:[%s1998_s0 + $0x14] sm:$0x3] }
 0x14a   :  { %v272_v59 = vmul.f32 %v1430_v50, %v271_v54 }
 0x14b   :  { %v1432_v61 = vpop.eup %1431  ;;  %v233_v62 = vadd.f32 %v1428_v48, %v232_v57 }
 0x14c   :  { %v273_v3 = vadd.f32 %v1430_v50, %v272_v59  ;;  %v332_v14 = vmul.f32 %v1432_v61, %v330_v47  ;;  %v1434_v21 = vpop.eup %1433  ;;  %vm337_vm8 = vweird.f32 %v1432_v61 }
 0x14d   :  { %v237_v20 = vsel %vm236_vm4, %v1428_v48, %v233_v62  ;;  %vm338_vm10 = vmor %vm336_vm9, %vm337_vm8 }
 0x14e   :  { %v242_v22 = vsel %vm239_vm6, %v241_v63, %v237_v20  ;;  %v277_v23 = vsel %vm276_vm5, %v1430_v50, %v273_v3  ;;  %v333_v24 = vsub.f32 1.0, %v332_v14 }
 0x14f   :  { %v282_v25 = vsel %vm279_vm7, %v281_v18, %v277_v23  ;;  %v347_v26 = vmul.f32 %v1434_v21, %v242_v22 }
 0x150   :  { %v346_v27 = vmul.f32 %v282_v25, %v1711_v19  ;;  %v334_v28 = vmul.f32 %v1432_v61, %v333_v24  ;;  %v1332_v19 = vld [vmem:[%s1998_s0 + $0x10] sm:$0x3] }
 0x152   :  { %v1751_v29 = vadd.f32 %v347_v26, %v346_v27  ;;  %v335_v30 = vadd.f32 %v1432_v61, %v334_v28 }
 0x154   :  { %1435 = vtanh.f32 %v1751_v29  ;;  %v339_v33 = vsel %vm338_vm10, %v1432_v61, %v335_v30 }
 0x155   :  { %v344_v36 = vsel %vm341_vm11, %v343_v34, %v339_v33 }
 0x15a   :  { %v1436_v35 = vpop.eup %1435 }
 0x15b   :  { %v350_v37 = vmul.f32 %v1436_v35, %v344_v36 }
 0x15d   :  { %1331 = vst.msk [vmem:[%s1999_s2 + $0x2] sm:$0x3] %vm15_vm0, %v350_v37  ;;  %1336 = vmatmul.msk.f32.vlgmr.msra.gmra.mxu0 %vm43_vm1, %v350_v37  ;;  %1338 = vmatmul.msk.f32.vlgmr.msra.gmra.mxu1 %vm43_vm1, %v350_v37 }
 0x15e   :  { %1340 = vmatmul.msk.f32.vlgmr.msra.gmra.mxu2 %vm43_vm1, %v350_v37  ;;  %1341 = vmatmul.msk.f32.vlgmr.msra.gmra.mxu3 %vm43_vm1, %v350_v37 }
 0x15f   :  { %687 = vmatpush.msra.mxu0 %v1568_v0  ;;  %727 = vmatpush.msra.mxu1 %v1573_v1 }
 0x160   :  { %767 = vmatpush.msra.mxu2 %v1631_v12  ;;  %789 = vmatpush.msra.mxu3 %v1578_v2 }
 0x161   :  { %688 = vmatpush.msra.mxu0 %v1586_v4  ;;  %728 = vmatpush.msra.mxu1 %v1591_v5 }
 0x162   :  { %768 = vmatpush.msra.mxu2 %v1647_v15  ;;  %790 = vmatpush.msra.mxu3 %v1596_v6 }
 0x163   :  { %689 = vmatpush.msra.mxu0 %v1603_v7  ;;  %729 = vmatpush.msra.mxu1 %v1608_v8 }
 0x164   :  { %769 = vmatpush.msra.mxu2 %v1656_v16  ;;  %791 = vmatpush.msra.mxu3 %v1615_v9 }
 0x165   :  { %690 = vmatpush.msra.mxu0 %v1621_v10  ;;  %730 = vmatpush.msra.mxu1 %v1626_v11 }
 0x166   :  { %770 = vmatpush.msra.mxu2 %v1663_v17  ;;  %792 = vmatpush.msra.mxu3 %v1638_v13 }
 0x1da   :  { %v378_v39 = vpop.f32.mrf.mxu0  ;;  %v418_v40 = vpop.f32.mrf.mxu1 }
 0x1db   :  { %v381_v41 = vadd.f32 %v1332_v19, %v378_v39  ;;  %v421_v42 = vadd.f32 %v1333_v38, %v418_v40 }
 0x1dd   :  { %v1337_v43 = vmul.f32 -1.442695, %v381_v41  ;;  %v1339_v44 = vmul.f32 -1.442695, %v421_v42 }
 0x1df   :  { %1437 = vpow2.f32 %v1337_v43 }
 0x1e0   :  { %1439 = vpow2.f32 %v1339_v44 }
 0x1e1   :  { %v480_v46 = vpop.f32.mrf.mxu3  ;;  %v458_v54 = vpop.f32.mrf.mxu2 }
 0x1e2   :  { %v483_v47 = vadd.f32 %v1335_v45, %v480_v46  ;;  %v461_v58 = vadd.f32 %v1334_v53, %v458_v54  ;;  %v1347_v54 = vld [vmem:[%s1998_s0 + $0x1e] sm:$0x3] }
 0x1e4   :  { %v1342_v48 = vmul.f32 -1.442695, %v483_v47  ;;  %v1345_v47 = vld [vmem:[%s1998_s0 + $0x1a] sm:$0x3] }
 0x1e5   :  { %v1438_v49 = vpop.eup %1437 }
 0x1e6   :  { %v1440_v50 = vpop.eup %1439  ;;  %v385_v51 = vadd.f32 1.0, %v1438_v49  ;;  %1441 = vpow2.f32 %v1342_v48 }
 0x1e7   :  { %v425_v52 = vadd.f32 1.0, %v1440_v50 }
 0x1e8   :  { %1443 = vrcp.f32 %v385_v51  ;;  %v397_v3 = vand.u32 2147483648, %v385_v51  ;;  %v395_v20 = vand.u32 2147483647, %v385_v51  ;;  %vm391_vm14 = vweird.f32 %v385_v51 }
 0x1e9   :  { %1445 = vrcp.f32 %v425_v52  ;;  %v437_v14 = vand.u32 2147483648, %v425_v52  ;;  %v435_v22 = vand.u32 2147483647, %v425_v52  ;;  %vm431_vm15 = vweird.f32 %v425_v52 }
 0x1ea   :  { %v398_v25 = vor.u32 1.1754944e-38, %v397_v3  ;;  %vm396_vm4 = vcmp.eq.f32.partialorder %v395_v20, 8.507059e+37 }
 0x1eb   :  { %v438_v28 = vor.u32 1.1754944e-38, %v437_v14  ;;  %vm436_vm5 = vcmp.eq.f32.partialorder %v435_v22, 8.507059e+37 }
 0x1ec   :  { %v1442_v55 = vpop.eup %1441 }
 0x1ed   :  { %v487_v56 = vadd.f32 1.0, %v1442_v55 }
 0x1ee   :  { %v1444_v57 = vpop.eup %1443 }
 0x1ef   :  { %v1446_v59 = vpop.eup %1445  ;;  %v387_v60 = vmul.f32 %v1444_v57, %v385_v51  ;;  %1447 = vrcp.f32 %v487_v56  ;;  %vm392_vm12 = vweird.f32 %v1444_v57  ;;  %v499_v40 = vand.u32 2147483648, %v487_v56 }
 0x1f0   :  { %v427_v61 = vmul.f32 %v1446_v59, %v425_v52  ;;  %1449 = vtanh.f32 %v461_v58  ;;  %vm432_vm13 = vweird.f32 %v1446_v59  ;;  %vm393_vm2 = vmor %vm391_vm14, %vm392_vm12  ;;  %vm493_vm7 = vweird.f32 %v487_v56 }
 0x1f1   :  { %v388_v62 = vsub.f32 1.0, %v387_v60  ;;  %vm433_vm3 = vmor %vm431_vm15, %vm432_vm13  ;;  %v497_v41 = vand.u32 2147483647, %v487_v56  ;;  %v500_v43 = vor.u32 1.1754944e-38, %v499_v40 }
 0x1f2   :  { %v428_v63 = vsub.f32 1.0, %v427_v61 }
 0x1f3   :  { %v389_v18 = vmul.f32 %v1444_v57, %v388_v62  ;;  %vm498_vm9 = vcmp.eq.f32.partialorder %v497_v41, 8.507059e+37  ;;  %v1346_v62 = vld [vmem:[%s1998_s0 + $0x1c] sm:$0x3] }
 0x1f4   :  { %v429_v21 = vmul.f32 %v1446_v59, %v428_v63 }
 0x1f5   :  { %v1448_v23 = vpop.eup %1447  ;;  %v390_v24 = vadd.f32 %v1444_v57, %v389_v18 }
 0x1f6   :  { %v430_v26 = vadd.f32 %v1446_v59, %v429_v21  ;;  %v489_v27 = vmul.f32 %v1448_v23, %v487_v56  ;;  %v1450_v31 = vpop.eup %1449  ;;  %vm494_vm6 = vweird.f32 %v1448_v23 }
 0x1f7   :  { %v394_v30 = vsel %vm393_vm2, %v1444_v57, %v390_v24  ;;  %vm495_vm8 = vmor %vm493_vm7, %vm494_vm6 }
 0x1f8   :  { %v399_v32 = vsel %vm396_vm4, %v398_v25, %v394_v30  ;;  %v434_v33 = vsel %vm433_vm3, %v1446_v59, %v430_v26  ;;  %v490_v34 = vsub.f32 1.0, %v489_v27 }
 0x1f9   :  { %v439_v35 = vsel %vm436_vm5, %v438_v28, %v434_v33  ;;  %v504_v36 = vmul.f32 %v1450_v31, %v399_v32 }
 0x1fa   :  { %v503_v37 = vmul.f32 %v439_v35, %v1751_v29  ;;  %v491_v19 = vmul.f32 %v1448_v23, %v490_v34  ;;  %v1344_v29 = vld [vmem:[%s1998_s0 + $0x18] sm:$0x3] }
 0x1fc   :  { %v1791_v38 = vadd.f32 %v504_v36, %v503_v37  ;;  %v492_v39 = vadd.f32 %v1448_v23, %v491_v19 }
 0x1fe   :  { %1451 = vtanh.f32 %v1791_v38  ;;  %v496_v42 = vsel %vm495_vm8, %v1448_v23, %v492_v39 }
 0x1ff   :  { %v501_v45 = vsel %vm498_vm9, %v500_v43, %v496_v42 }
 0x204   :  { %v1452_v44 = vpop.eup %1451 }
 0x205   :  { %v507_v46 = vmul.f32 %v1452_v44, %v501_v45 }
 0x207   :  { %1343 = vst.msk [vmem:[%s1999_s2 + $0x4] sm:$0x3] %vm15_vm0, %v507_v46  ;;  %1348 = vmatmul.msk.f32.vlgmr.msrb.gmra.mxu0 %vm43_vm1, %v507_v46  ;;  %1350 = vmatmul.msk.f32.vlgmr.msrb.gmra.mxu1 %vm43_vm1, %v507_v46 }
 0x208   :  { %1352 = vmatmul.msk.f32.vlgmr.msrb.gmra.mxu2 %vm43_vm1, %v507_v46  ;;  %1353 = vmatmul.msk.f32.vlgmr.msrb.gmra.mxu3 %vm43_vm1, %v507_v46 }
 0x209   :  { %844 = vmatpush.msrb.mxu0 %v1568_v0  ;;  %884 = vmatpush.msrb.mxu1 %v1573_v1 }
 0x20a   :  { %924 = vmatpush.msrb.mxu2 %v1631_v12  ;;  %946 = vmatpush.msrb.mxu3 %v1578_v2 }
 0x20b   :  { %845 = vmatpush.msrb.mxu0 %v1586_v4  ;;  %885 = vmatpush.msrb.mxu1 %v1591_v5 }
 0x20c   :  { %925 = vmatpush.msrb.mxu2 %v1647_v15  ;;  %947 = vmatpush.msrb.mxu3 %v1596_v6 }
 0x20d   :  { %846 = vmatpush.msrb.mxu0 %v1603_v7  ;;  %886 = vmatpush.msrb.mxu1 %v1608_v8 }
 0x20e   :  { %926 = vmatpush.msrb.mxu2 %v1656_v16  ;;  %948 = vmatpush.msrb.mxu3 %v1615_v9 }
 0x20f   :  { %847 = vmatpush.msrb.mxu0 %v1621_v10  ;;  %887 = vmatpush.msrb.mxu1 %v1626_v11 }
 0x210   :  { %927 = vmatpush.msrb.mxu2 %v1663_v17  ;;  %949 = vmatpush.msrb.mxu3 %v1638_v13 }
 0x284   :  { %v535_v48 = vpop.f32.mrf.mxu0  ;;  %v575_v49 = vpop.f32.mrf.mxu1 }
 0x285   :  { %v538_v50 = vadd.f32 %v1344_v29, %v535_v48  ;;  %v578_v51 = vadd.f32 %v1345_v47, %v575_v49 }
 0x287   :  { %v1349_v52 = vmul.f32 -1.442695, %v538_v50  ;;  %v1351_v53 = vmul.f32 -1.442695, %v578_v51 }
 0x289   :  { %1453 = vpow2.f32 %v1349_v52 }
 0x28a   :  { %1455 = vpow2.f32 %v1351_v53 }
 0x28b   :  { %v637_v55 = vpop.f32.mrf.mxu3  ;;  %v615_v63 = vpop.f32.mrf.mxu2 }
 0x28c   :  { %v640_v56 = vadd.f32 %v1347_v54, %v637_v55  ;;  %v618_v20 = vadd.f32 %v1346_v62, %v615_v63 }
 0x28e   :  { %v1354_v57 = vmul.f32 -1.442695, %v640_v56 }
 0x28f   :  { %v1454_v58 = vpop.eup %1453 }
 0x290   :  { %v1456_v59 = vpop.eup %1455  ;;  %v542_v60 = vadd.f32 1.0, %v1454_v58  ;;  %1457 = vpow2.f32 %v1354_v57 }
 0x291   :  { %v582_v61 = vadd.f32 1.0, %v1456_v59 }
 0x292   :  { %1459 = vrcp.f32 %v542_v60  ;;  %v554_v26 = vand.u32 2147483648, %v542_v60  ;;  %v552_v30 = vand.u32 2147483647, %v542_v60  ;;  %vm548_vm12 = vweird.f32 %v542_v60 }
 0x293   :  { %1461 = vrcp.f32 %v582_v61  ;;  %v594_v27 = vand.u32 2147483648, %v582_v61  ;;  %v592_v32 = vand.u32 2147483647, %v582_v61  ;;  %vm588_vm13 = vweird.f32 %v582_v61 }
 0x294   :  { %v555_v35 = vor.u32 1.1754944e-38, %v554_v26  ;;  %vm553_vm2 = vcmp.eq.f32.partialorder %v552_v30, 8.507059e+37 }
 0x295   :  { %v595_v19 = vor.u32 1.1754944e-38, %v594_v27  ;;  %vm593_vm3 = vcmp.eq.f32.partialorder %v592_v32, 8.507059e+37 }
 0x296   :  { %v1458_v3 = vpop.eup %1457 }
 0x297   :  { %v644_v14 = vadd.f32 1.0, %v1458_v3 }
 0x298   :  { %v1460_v18 = vpop.eup %1459 }
 0x299   :  { %v1462_v21 = vpop.eup %1461  ;;  %v544_v22 = vmul.f32 %v1460_v18, %v542_v60  ;;  %1463 = vrcp.f32 %v644_v14  ;;  %vm549_vm10 = vweird.f32 %v1460_v18  ;;  %v656_v49 = vand.u32 2147483648, %v644_v14 }
 0x29a   :  { %v584_v23 = vmul.f32 %v1462_v21, %v582_v61  ;;  %1465 = vtanh.f32 %v618_v20  ;;  %vm589_vm11 = vweird.f32 %v1462_v21  ;;  %vm550_vm14 = vmor %vm548_vm12, %vm549_vm10  ;;  %vm650_vm5 = vweird.f32 %v644_v14 }
 0x29b   :  { %v545_v24 = vsub.f32 1.0, %v544_v22  ;;  %vm590_vm15 = vmor %vm588_vm13, %vm589_vm11  ;;  %v654_v50 = vand.u32 2147483647, %v644_v14  ;;  %v657_v52 = vor.u32 1.1754944e-38, %v656_v49 }
 0x29c   :  { %v585_v25 = vsub.f32 1.0, %v584_v23 }
 0x29d   :  { %v546_v28 = vmul.f32 %v1460_v18, %v545_v24  ;;  %vm655_vm7 = vcmp.eq.f32.partialorder %v654_v50, 8.507059e+37  ;;  %v1534_v50 = vld [vmem:[%s1997_s1 + $0x38] sm:$0xff] }
 0x29e   :  { %v586_v31 = vmul.f32 %v1462_v21, %v585_v25 }
 0x29f   :  { %v1464_v33 = vpop.eup %1463  ;;  %v547_v34 = vadd.f32 %v1460_v18, %v546_v28 }
 0x2a0   :  { %v587_v36 = vadd.f32 %v1462_v21, %v586_v31  ;;  %v646_v37 = vmul.f32 %v1464_v33, %v644_v14  ;;  %v1466_v40 = vpop.eup %1465  ;;  %vm651_vm4 = vweird.f32 %v1464_v33 }
 0x2a1   :  { %v551_v39 = vsel %vm550_vm14, %v1460_v18, %v547_v34  ;;  %vm652_vm6 = vmor %vm650_vm5, %vm651_vm4 }
 0x2a2   :  { %v556_v41 = vsel %vm553_vm2, %v555_v35, %v551_v39  ;;  %v591_v42 = vsel %vm590_vm15, %v1462_v21, %v587_v36  ;;  %v647_v43 = vsub.f32 1.0, %v646_v37 }
 0x2a3   :  { %v596_v44 = vsel %vm593_vm3, %v595_v19, %v591_v42  ;;  %v661_v45 = vmul.f32 %v1466_v40, %v556_v41 }
 0x2a4   :  { %v660_v46 = vmul.f32 %v596_v44, %v1791_v38  ;;  %v648_v29 = vmul.f32 %v1464_v33, %v647_v43  ;;  %v1358_v38 = vld [vmem:[%s1998_s0 + $0x24] sm:$0x3] }
 0x2a6   :  { %v1831_v47 = vadd.f32 %v661_v45, %v660_v46  ;;  %v649_v48 = vadd.f32 %v1464_v33, %v648_v29 }
 0x2a8   :  { %1467 = vtanh.f32 %v1831_v47  ;;  %v653_v51 = vsel %vm652_vm6, %v1464_v33, %v649_v48 }
 0x2a9   :  { %v658_v54 = vsel %vm655_vm7, %v657_v52, %v653_v51  ;;  %v1535_v51 = vld [vmem:[%s1997_s1 + $0x58] sm:$0xff] }
 0x2aa   :  { %v1536_v52 = vld [vmem:[%s1997_s1 + $0x78] sm:$0xff] }
 0x2ae   :  { %v1468_v53 = vpop.eup %1467 }
 0x2af   :  { %v664_v55 = vmul.f32 %v1468_v53, %v658_v54  ;;  %v1537_v53 = vld [vmem:[%s1997_s1 + $0x10] sm:$0xff] }
 0x2b0   :  { %v1538_v54 = vld [vmem:[%s1997_s1 + $0x30] sm:$0xff] }
 0x2b1   :  { %1355 = vst.msk [vmem:[%s1999_s2 + $0x6] sm:$0x3] %vm15_vm0, %v664_v55  ;;  %1360 = vmatmul.msk.f32.vlgmr.msra.gmra.mxu0 %vm43_vm1, %v664_v55  ;;  %1362 = vmatmul.msk.f32.vlgmr.msra.gmra.mxu1 %vm43_vm1, %v664_v55 }
 0x2b2   :  { %1364 = vmatmul.msk.f32.vlgmr.msra.gmra.mxu2 %vm43_vm1, %v664_v55  ;;  %1365 = vmatmul.msk.f32.vlgmr.msra.gmra.mxu3 %vm43_vm1, %v664_v55  ;;  %v1539_v55 = vld [vmem:[%s1997_s1 + $0x50] sm:$0xff] }
 0x2b3   :  { %1001 = vmatpush.msra.mxu0 %v1568_v0  ;;  %1041 = vmatpush.msra.mxu1 %v1573_v1  ;;  %v1356_v0 = vld [vmem:[%s1998_s0 + $0x20] sm:$0x3]  ;;  %v1357_v1 = vld [vmem:[%s1998_s0 + $0x22] sm:$0x3] }
 0x2b4   :  { %1081 = vmatpush.msra.mxu2 %v1631_v12  ;;  %1103 = vmatpush.msra.mxu3 %v1578_v2 }
 0x2b5   :  { %1002 = vmatpush.msra.mxu0 %v1586_v4  ;;  %1042 = vmatpush.msra.mxu1 %v1591_v5 }
 0x2b6   :  { %1082 = vmatpush.msra.mxu2 %v1647_v15  ;;  %1104 = vmatpush.msra.mxu3 %v1596_v6 }
 0x2b7   :  { %1003 = vmatpush.msra.mxu0 %v1603_v7  ;;  %1043 = vmatpush.msra.mxu1 %v1608_v8 }
 0x2b8   :  { %1083 = vmatpush.msra.mxu2 %v1656_v16  ;;  %1105 = vmatpush.msra.mxu3 %v1615_v9  ;;  %v1359_v9 = vld [vmem:[%s1998_s0 + $0x26] sm:$0x3] }
 0x2b9   :  { %1004 = vmatpush.msra.mxu0 %v1621_v10  ;;  %1044 = vmatpush.msra.mxu1 %v1626_v11 }
 0x2ba   :  { %1084 = vmatpush.msra.mxu2 %v1663_v17  ;;  %1106 = vmatpush.msra.mxu3 %v1638_v13 }
 0x32e   :  { %v692_v2 = vpop.f32.mrf.mxu0  ;;  %v732_v4 = vpop.f32.mrf.mxu1 }
 0x32f   :  { %v695_v5 = vadd.f32 %v1356_v0, %v692_v2  ;;  %v735_v6 = vadd.f32 %v1357_v1, %v732_v4  ;;  %v1540_v0 = vld [vmem:[%s1997_s1 + $0x70] sm:$0xff]  ;;  %v1541_v1 = vld [vmem:[%s1997_s1 + $0x8] sm:$0xff] }
 0x330   :  { %v1542_v2 = vld [vmem:[%s1997_s1 + $0x28] sm:$0xff] }
 0x331   :  { %v1361_v7 = vmul.f32 -1.442695, %v695_v5  ;;  %v1363_v8 = vmul.f32 -1.442695, %v735_v6  ;;  %v1543_v4 = vld [vmem:[%s1997_s1 + $0x48] sm:$0xff]  ;;  %v1545_v6 = vld [vmem:[%s1997_s1] sm:$0xff] }
 0x332   :  { %v1544_v5 = vld [vmem:[%s1997_s1 + $0x68] sm:$0xff] }
 0x333   :  { %1469 = vpow2.f32 %v1361_v7  ;;  %v1546_v7 = vld [vmem:[%s1997_s1 + $0x20] sm:$0xff] }
 0x334   :  { %1471 = vpow2.f32 %v1363_v8  ;;  %v1547_v8 = vld [vmem:[%s1997_s1 + $0x40] sm:$0xff] }
 0x335   :  { %v794_v10 = vpop.f32.mrf.mxu3  ;;  %v772_v56 = vpop.f32.mrf.mxu2 }
 0x336   :  { %v797_v11 = vadd.f32 %v1359_v9, %v794_v10  ;;  %v775_v60 = vadd.f32 %v1358_v38, %v772_v56  ;;  %v1548_v9 = vld [vmem:[%s1997_s1 + $0x60] sm:$0xff]  ;;  %v1368_v10 = vld [vmem:[%s1998_s0 + $0x28] sm:$0x3]  ;;  %v1371_v56 = vld [vmem:[%s1998_s0 + $0x2e] sm:$0x3] }
 0x338   :  { %v1366_v12 = vmul.f32 -1.442695, %v797_v11  ;;  %v1369_v11 = vld [vmem:[%s1998_s0 + $0x2a] sm:$0x3] }
 0x339   :  { %v1470_v13 = vpop.eup %1469 }
 0x33a   :  { %v1472_v15 = vpop.eup %1471  ;;  %v699_v16 = vadd.f32 1.0, %v1470_v13  ;;  %1473 = vpow2.f32 %v1366_v12 }
 0x33b   :  { %v739_v17 = vadd.f32 1.0, %v1472_v15 }
 0x33c   :  { %1475 = vrcp.f32 %v699_v16  ;;  %v711_v18 = vand.u32 2147483648, %v699_v16  ;;  %v709_v22 = vand.u32 2147483647, %v699_v16  ;;  %vm705_vm10 = vweird.f32 %v699_v16 }
 0x33d   :  { %1477 = vrcp.f32 %v739_v17  ;;  %v751_v20 = vand.u32 2147483648, %v739_v17  ;;  %v749_v24 = vand.u32 2147483647, %v739_v17  ;;  %vm745_vm11 = vweird.f32 %v739_v17 }
 0x33e   :  { %v712_v27 = vor.u32 1.1754944e-38, %v711_v18  ;;  %vm710_vm14 = vcmp.eq.f32.partialorder %v709_v22, 8.507059e+37 }
 0x33f   :  { %v752_v31 = vor.u32 1.1754944e-38, %v751_v20  ;;  %vm750_vm15 = vcmp.eq.f32.partialorder %v749_v24, 8.507059e+37 }
 0x340   :  { %v1474_v57 = vpop.eup %1473 }
 0x341   :  { %v801_v58 = vadd.f32 1.0, %v1474_v57 }
 0x342   :  { %v1476_v59 = vpop.eup %1475 }
 0x343   :  { %v1478_v61 = vpop.eup %1477  ;;  %v701_v62 = vmul.f32 %v1476_v59, %v699_v16  ;;  %1479 = vrcp.f32 %v801_v58  ;;  %vm706_vm8 = vweird.f32 %v1476_v59  ;;  %v813_v43 = vand.u32 2147483648, %v801_v58 }
 0x344   :  { %v741_v63 = vmul.f32 %v1478_v61, %v739_v17  ;;  %1481 = vtanh.f32 %v775_v60  ;;  %vm746_vm9 = vweird.f32 %v1478_v61  ;;  %vm707_vm12 = vmor %vm705_vm10, %vm706_vm8  ;;  %vm807_vm3 = vweird.f32 %v801_v58 }
 0x345   :  { %v702_v3 = vsub.f32 1.0, %v701_v62  ;;  %vm747_vm13 = vmor %vm745_vm11, %vm746_vm9  ;;  %v811_v44 = vand.u32 2147483647, %v801_v58  ;;  %v814_v46 = vor.u32 1.1754944e-38, %v813_v43 }
 0x346   :  { %v742_v14 = vsub.f32 1.0, %v741_v63 }
 0x347   :  { %v703_v21 = vmul.f32 %v1476_v59, %v702_v3  ;;  %vm812_vm5 = vcmp.eq.f32.partialorder %v811_v44, 8.507059e+37  ;;  %v1370_v3 = vld [vmem:[%s1998_s0 + $0x2c] sm:$0x3] }
 0x348   :  { %v743_v23 = vmul.f32 %v1478_v61, %v742_v14 }
 0x349   :  { %v1480_v25 = vpop.eup %1479  ;;  %v704_v26 = vadd.f32 %v1476_v59, %v703_v21 }
 0x34a   :  { %v744_v28 = vadd.f32 %v1478_v61, %v743_v23  ;;  %v803_v30 = vmul.f32 %v1480_v25, %v801_v58  ;;  %v1482_v33 = vpop.eup %1481  ;;  %vm808_vm2 = vweird.f32 %v1480_v25 }
 0x34b   :  { %v708_v32 = vsel %vm707_vm12, %v1476_v59, %v704_v26  ;;  %vm809_vm4 = vmor %vm807_vm3, %vm808_vm2 }
 0x34c   :  { %v713_v34 = vsel %vm710_vm14, %v712_v27, %v708_v32  ;;  %v748_v35 = vsel %vm747_vm13, %v1478_v61, %v744_v28  ;;  %v804_v36 = vsub.f32 1.0, %v803_v30 }
 0x34d   :  { %v753_v37 = vsel %vm750_vm15, %v752_v31, %v748_v35  ;;  %v818_v19 = vmul.f32 %v1482_v33, %v713_v34 }
 0x34e   :  { %v817_v39 = vmul.f32 %v753_v37, %v1831_v47  ;;  %v805_v40 = vmul.f32 %v1480_v25, %v804_v36  ;;  %v1533_v47 = vld [vmem:[%s1997_s1 + $0x18] sm:$0xff] }
 0x350   :  { %v1871_v41 = vadd.f32 %v818_v19, %v817_v39  ;;  %v806_v42 = vadd.f32 %v1480_v25, %v805_v40 }
 0x352   :  { %1483 = vtanh.f32 %v1871_v41  ;;  %v810_v45 = vsel %vm809_vm4, %v1480_v25, %v806_v42 }
 0x353   :  { %v815_v48 = vsel %vm812_vm5, %v814_v46, %v810_v45 }
 0x358   :  { %v1484_v29 = vpop.eup %1483 }
 0x359   :  { %v821_v49 = vmul.f32 %v1484_v29, %v815_v48 }
 0x35b   :  { %1367 = vst.msk [vmem:[%s1999_s2 + $0x8] sm:$0x3] %vm15_vm0, %v821_v49  ;;  %1372 = vmatmul.msk.f32.vlgmr.msrb.gmra.mxu0 %vm43_vm1, %v821_v49  ;;  %1374 = vmatmul.msk.f32.vlgmr.msrb.gmra.mxu1 %vm43_vm1, %v821_v49 }
 0x35c   :  { %1376 = vmatmul.msk.f32.vlgmr.msrb.gmra.mxu2 %vm43_vm1, %v821_v49  ;;  %1377 = vmatmul.msk.f32.vlgmr.msrb.gmra.mxu3 %vm43_vm1, %v821_v49 }
 0x35d   :  { %1158 = vmatpush.msrb.mxu0 %v1533_v47  ;;  %1198 = vmatpush.msrb.mxu1 %v1534_v50 }
 0x35e   :  { %1238 = vmatpush.msrb.mxu2 %v1535_v51  ;;  %1260 = vmatpush.msrb.mxu3 %v1536_v52 }
 0x35f   :  { %1159 = vmatpush.msrb.mxu0 %v1537_v53  ;;  %1199 = vmatpush.msrb.mxu1 %v1538_v54 }
 0x360   :  { %1239 = vmatpush.msrb.mxu2 %v1539_v55  ;;  %1261 = vmatpush.msrb.mxu3 %v1540_v0 }
 0x361   :  { %1160 = vmatpush.msrb.mxu0 %v1541_v1  ;;  %1200 = vmatpush.msrb.mxu1 %v1542_v2 }
 0x362   :  { %1240 = vmatpush.msrb.mxu2 %v1543_v4  ;;  %1262 = vmatpush.msrb.mxu3 %v1544_v5  ;;  %v1381_v4 = vld [vmem:[%s1998_s0 + $0x32] sm:$0x3] }
 0x363   :  { %1161 = vmatpush.msrb.mxu0 %v1545_v6  ;;  %1201 = vmatpush.msrb.mxu1 %v1546_v7 }
 0x364   :  { %1241 = vmatpush.msrb.mxu2 %v1547_v8  ;;  %1263 = vmatpush.msrb.mxu3 %v1548_v9 }
 0x3d8   :  { %v849_v12 = vpop.f32.mrf.mxu0  ;;  %v889_v13 = vpop.f32.mrf.mxu1 }
 0x3d9   :  { %v852_v15 = vadd.f32 %v1368_v10, %v849_v12  ;;  %v892_v16 = vadd.f32 %v1369_v11, %v889_v13  ;;  %v1383_v11 = vld [vmem:[%s1998_s0 + $0x36] sm:$0x3] }
 0x3db   :  { %v1373_v17 = vmul.f32 -1.442695, %v852_v15  ;;  %v1375_v38 = vmul.f32 -1.442695, %v892_v16 }
 0x3dd   :  { %1485 = vpow2.f32 %v1373_v17 }
 0x3de   :  { %1487 = vpow2.f32 %v1375_v38 }
 0x3df   :  { %v951_v57 = vpop.f32.mrf.mxu3  ;;  %v929_v14 = vpop.f32.mrf.mxu2 }
 0x3e0   :  { %v954_v58 = vadd.f32 %v1371_v56, %v951_v57  ;;  %v932_v22 = vadd.f32 %v1370_v3, %v929_v14  ;;  %v1382_v57 = vld [vmem:[%s1998_s0 + $0x34] sm:$0x3] }
 0x3e2   :  { %v1378_v59 = vmul.f32 -1.442695, %v954_v58 }
 0x3e3   :  { %v1486_v60 = vpop.eup %1485 }
 0x3e4   :  { %v1488_v61 = vpop.eup %1487  ;;  %v856_v62 = vadd.f32 1.0, %v1486_v60  ;;  %1489 = vpow2.f32 %v1378_v59 }
 0x3e5   :  { %v896_v63 = vadd.f32 1.0, %v1488_v61 }
 0x3e6   :  { %1491 = vrcp.f32 %v856_v62  ;;  %v868_v28 = vand.u32 2147483648, %v856_v62  ;;  %v866_v32 = vand.u32 2147483647, %v856_v62  ;;  %vm862_vm8 = vweird.f32 %v856_v62 }
 0x3e7   :  { %1493 = vrcp.f32 %v896_v63  ;;  %v908_v30 = vand.u32 2147483648, %v896_v63  ;;  %v906_v34 = vand.u32 2147483647, %v896_v63  ;;  %vm902_vm9 = vweird.f32 %v896_v63 }
 0x3e8   :  { %v869_v37 = vor.u32 1.1754944e-38, %v868_v28  ;;  %vm867_vm12 = vcmp.eq.f32.partialorder %v866_v32, 8.507059e+37 }
 0x3e9   :  { %v909_v40 = vor.u32 1.1754944e-38, %v908_v30  ;;  %vm907_vm13 = vcmp.eq.f32.partialorder %v906_v34, 8.507059e+37 }
 0x3ea   :  { %v1490_v18 = vpop.eup %1489 }
 0x3eb   :  { %v958_v20 = vadd.f32 1.0, %v1490_v18 }
 0x3ec   :  { %v1492_v21 = vpop.eup %1491 }
 0x3ed   :  { %v1494_v23 = vpop.eup %1493  ;;  %v858_v24 = vmul.f32 %v1492_v21, %v856_v62  ;;  %1495 = vrcp.f32 %v958_v20  ;;  %vm863_vm6 = vweird.f32 %v1492_v21  ;;  %v970_v52 = vand.u32 2147483648, %v958_v20 }
 0x3ee   :  { %v898_v25 = vmul.f32 %v1494_v23, %v896_v63  ;;  %1497 = vtanh.f32 %v932_v22  ;;  %vm903_vm7 = vweird.f32 %v1494_v23  ;;  %vm864_vm10 = vmor %vm862_vm8, %vm863_vm6  ;;  %vm964_vm15 = vweird.f32 %v958_v20 }
 0x3ef   :  { %v859_v26 = vsub.f32 1.0, %v858_v24  ;;  %vm904_vm11 = vmor %vm902_vm9, %vm903_vm7  ;;  %v968_v53 = vand.u32 2147483647, %v958_v20  ;;  %v971_v55 = vor.u32 1.1754944e-38, %v970_v52 }
 0x3f0   :  { %v899_v27 = vsub.f32 1.0, %v898_v25 }
 0x3f1   :  { %v860_v31 = vmul.f32 %v1492_v21, %v859_v26  ;;  %vm969_vm3 = vcmp.eq.f32.partialorder %v968_v53, 8.507059e+37  ;;  %v1393_v53 = vld [vmem:[%s1998_s0 + $0x3a] sm:$0x3] }
 0x3f2   :  { %v900_v33 = vmul.f32 %v1494_v23, %v899_v27 }
 0x3f3   :  { %v1496_v35 = vpop.eup %1495  ;;  %v861_v36 = vadd.f32 %v1492_v21, %v860_v31 }
 0x3f4   :  { %v901_v19 = vadd.f32 %v1494_v23, %v900_v33  ;;  %v960_v39 = vmul.f32 %v1496_v35, %v958_v20  ;;  %v1498_v43 = vpop.eup %1497  ;;  %vm965_vm14 = vweird.f32 %v1496_v35 }
 0x3f5   :  { %v865_v42 = vsel %vm864_vm10, %v1492_v21, %v861_v36  ;;  %vm966_vm2 = vmor %vm964_vm15, %vm965_vm14 }
 0x3f6   :  { %v870_v44 = vsel %vm867_vm12, %v869_v37, %v865_v42  ;;  %v905_v45 = vsel %vm904_vm11, %v1494_v23, %v901_v19  ;;  %v961_v46 = vsub.f32 1.0, %v960_v39 }
 0x3f7   :  { %v910_v29 = vsel %vm907_vm13, %v909_v40, %v905_v45  ;;  %v975_v48 = vmul.f32 %v1498_v43, %v870_v44 }
 0x3f8   :  { %v974_v49 = vmul.f32 %v910_v29, %v1871_v41  ;;  %v962_v47 = vmul.f32 %v1496_v35, %v961_v46  ;;  %v1380_v41 = vld [vmem:[%s1998_s0 + $0x30] sm:$0x3] }
 0x3fa   :  { %v1943_v50 = vadd.f32 %v975_v48, %v974_v49  ;;  %v963_v51 = vadd.f32 %v1496_v35, %v962_v47 }
 0x3fc   :  { %1499 = vtanh.f32 %v1943_v50  ;;  %v967_v54 = vsel %vm966_vm2, %v1496_v35, %v963_v51 }
 0x3fd   :  { %v972_v1 = vsel %vm969_vm3, %v971_v55, %v967_v54 }
 0x402   :  { %v1500_v0 = vpop.eup %1499 }
 0x403   :  { %v978_v2 = vmul.f32 %v1500_v0, %v972_v1 }
 0x405   :  { %1379 = vst.msk [vmem:[%s1999_s2 + $0xa] sm:$0x3] %vm15_vm0, %v978_v2  ;;  %1384 = vmatmul.msk.f32.vlgmr.msra.gmra.mxu0 %vm43_vm1, %v978_v2  ;;  %1386 = vmatmul.msk.f32.vlgmr.msra.gmra.mxu1 %vm43_vm1, %v978_v2 }
 0x406   :  { %1388 = vmatmul.msk.f32.vlgmr.msra.gmra.mxu2 %vm43_vm1, %v978_v2  ;;  %1389 = vmatmul.msk.f32.vlgmr.msra.gmra.mxu3 %vm43_vm1, %v978_v2 }
 0x482   :  { %v1006_v5 = vpop.f32.mrf.mxu0  ;;  %v1046_v6 = vpop.f32.mrf.mxu1 }
 0x483   :  { %v1009_v7 = vadd.f32 %v1380_v41, %v1006_v5  ;;  %v1049_v8 = vadd.f32 %v1381_v4, %v1046_v6  ;;  %v1395_v4 = vld [vmem:[%s1998_s0 + $0x3e] sm:$0x3] }
 0x485   :  { %v1385_v9 = vmul.f32 -1.442695, %v1009_v7  ;;  %v1387_v10 = vmul.f32 -1.442695, %v1049_v8 }
 0x487   :  { %1501 = vpow2.f32 %v1385_v9 }
 0x488   :  { %1503 = vpow2.f32 %v1387_v10 }
 0x489   :  { %v1108_v12 = vpop.f32.mrf.mxu3  ;;  %v1086_v58 = vpop.f32.mrf.mxu2 }
 0x48a   :  { %v1111_v13 = vadd.f32 %v1383_v11, %v1108_v12  ;;  %v1089_v62 = vadd.f32 %v1382_v57, %v1086_v58  ;;  %v1394_v12 = vld [vmem:[%s1998_s0 + $0x3c] sm:$0x3] }
 0x48c   :  { %v1390_v15 = vmul.f32 -1.442695, %v1111_v13 }
 0x48d   :  { %v1502_v16 = vpop.eup %1501 }
 0x48e   :  { %v1504_v17 = vpop.eup %1503  ;;  %v1013_v38 = vadd.f32 1.0, %v1502_v16  ;;  %1505 = vpow2.f32 %v1390_v15 }
 0x48f   :  { %v1053_v56 = vadd.f32 1.0, %v1504_v17 }
 0x490   :  { %1507 = vrcp.f32 %v1013_v38  ;;  %v1025_v21 = vand.u32 2147483648, %v1013_v38  ;;  %v1023_v24 = vand.u32 2147483647, %v1013_v38  ;;  %vm1019_vm6 = vweird.f32 %v1013_v38 }
 0x491   :  { %1509 = vrcp.f32 %v1053_v56  ;;  %v1065_v22 = vand.u32 2147483648, %v1053_v56  ;;  %v1063_v26 = vand.u32 2147483647, %v1053_v56  ;;  %vm1059_vm7 = vweird.f32 %v1053_v56 }
 0x492   :  { %v1026_v30 = vor.u32 1.1754944e-38, %v1025_v21  ;;  %vm1024_vm10 = vcmp.eq.f32.partialorder %v1023_v24, 8.507059e+37 }
 0x493   :  { %v1066_v33 = vor.u32 1.1754944e-38, %v1065_v22  ;;  %vm1064_vm11 = vcmp.eq.f32.partialorder %v1063_v26, 8.507059e+37 }
 0x494   :  { %v1506_v59 = vpop.eup %1505 }
 0x495   :  { %v1115_v60 = vadd.f32 1.0, %v1506_v59 }
 0x496   :  { %v1508_v61 = vpop.eup %1507 }
 0x497   :  { %v1510_v63 = vpop.eup %1509  ;;  %v1015_v3 = vmul.f32 %v1508_v61, %v1013_v38  ;;  %1511 = vrcp.f32 %v1115_v60  ;;  %vm1020_vm4 = vweird.f32 %v1508_v61  ;;  %v1127_v46 = vand.u32 2147483648, %v1115_v60 }
 0x498   :  { %v1055_v14 = vmul.f32 %v1510_v63, %v1053_v56  ;;  %1513 = vtanh.f32 %v1089_v62  ;;  %vm1060_vm5 = vweird.f32 %v1510_v63  ;;  %vm1021_vm8 = vmor %vm1019_vm6, %vm1020_vm4  ;;  %vm1121_vm13 = vweird.f32 %v1115_v60 }
 0x499   :  { %v1016_v18 = vsub.f32 1.0, %v1015_v3  ;;  %vm1061_vm9 = vmor %vm1059_vm7, %vm1060_vm5  ;;  %v1125_v29 = vand.u32 2147483647, %v1115_v60  ;;  %v1128_v49 = vor.u32 1.1754944e-38, %v1127_v46 }
 0x49a   :  { %v1056_v20 = vsub.f32 1.0, %v1055_v14 }
 0x49b   :  { %v1017_v23 = vmul.f32 %v1508_v61, %v1016_v18  ;;  %vm1126_vm15 = vcmp.eq.f32.partialorder %v1125_v29, 8.507059e+37 }
 0x49c   :  { %v1057_v25 = vmul.f32 %v1510_v63, %v1056_v20 }
 0x49d   :  { %v1512_v27 = vpop.eup %1511  ;;  %v1018_v28 = vadd.f32 %v1508_v61, %v1017_v23 }
 0x49e   :  { %v1058_v31 = vadd.f32 %v1510_v63, %v1057_v25  ;;  %v1117_v32 = vmul.f32 %v1512_v27, %v1115_v60  ;;  %v1514_v35 = vpop.eup %1513  ;;  %vm1122_vm12 = vweird.f32 %v1512_v27 }
 0x49f   :  { %v1022_v34 = vsel %vm1021_vm8, %v1508_v61, %v1018_v28  ;;  %vm1123_vm14 = vmor %vm1121_vm13, %vm1122_vm12 }
 0x4a0   :  { %v1027_v36 = vsel %vm1024_vm10, %v1026_v30, %v1022_v34  ;;  %v1062_v37 = vsel %vm1061_vm9, %v1510_v63, %v1058_v31  ;;  %v1118_v19 = vsub.f32 1.0, %v1117_v32 }
 0x4a1   :  { %v1067_v39 = vsel %vm1064_vm11, %v1066_v33, %v1062_v37  ;;  %v1132_v40 = vmul.f32 %v1514_v35, %v1027_v36 }
 0x4a2   :  { %v1131_v42 = vmul.f32 %v1067_v39, %v1943_v50  ;;  %v1119_v43 = vmul.f32 %v1512_v27, %v1118_v19  ;;  %v1392_v50 = vld [vmem:[%s1998_s0 + $0x38] sm:$0x3] }
 0x4a4   :  { %v1967_v44 = vadd.f32 %v1132_v40, %v1131_v42  ;;  %v1120_v45 = vadd.f32 %v1512_v27, %v1119_v43 }
 0x4a6   :  { %1515 = vtanh.f32 %v1967_v44  ;;  %v1124_v48 = vsel %vm1123_vm14, %v1512_v27, %v1120_v45 }
 0x4a7   :  { %v1129_v51 = vsel %vm1126_vm15, %v1128_v49, %v1124_v48 }
 0x4ac   :  { %v1516_v47 = vpop.eup %1515 }
 0x4ad   :  { %v1135_v52 = vmul.f32 %v1516_v47, %v1129_v51 }
 0x4af   :  { %1391 = vst.msk [vmem:[%s1999_s2 + $0xc] sm:$0x3] %vm15_vm0, %v1135_v52  ;;  %1396 = vmatmul.msk.f32.vlgmr.msrb.gmra.mxu0 %vm43_vm1, %v1135_v52  ;;  %1398 = vmatmul.msk.f32.vlgmr.msrb.gmra.mxu1 %vm43_vm1, %v1135_v52 }
 0x4b0   :  { %1400 = vmatmul.msk.f32.vlgmr.msrb.gmra.mxu2 %vm43_vm1, %v1135_v52  ;;  %1401 = vmatmul.msk.f32.vlgmr.msrb.gmra.mxu3 %vm43_vm1, %v1135_v52 }
 0x52c   :  { %v1163_v54 = vpop.f32.mrf.mxu0  ;;  %v1203_v55 = vpop.f32.mrf.mxu1 }
 0x52d   :  { %v1166_v0 = vadd.f32 %v1392_v50, %v1163_v54  ;;  %v1206_v1 = vadd.f32 %v1393_v53, %v1203_v55 }
 0x52f   :  { %v1397_v2 = vmul.f32 -1.442695, %v1166_v0  ;;  %v1399_v41 = vmul.f32 -1.442695, %v1206_v1 }
 0x531   :  { %1517 = vpow2.f32 %v1397_v2 }
 0x532   :  { %1519 = vpow2.f32 %v1399_v41 }
 0x533   :  { %v1265_v5 = vpop.f32.mrf.mxu3  ;;  %v1243_v13 = vpop.f32.mrf.mxu2 }
 0x534   :  { %v1268_v6 = vadd.f32 %v1395_v4, %v1265_v5  ;;  %v1246_v38 = vadd.f32 %v1394_v12, %v1243_v13 }
 0x536   :  { %v1402_v7 = vmul.f32 -1.442695, %v1268_v6 }
 0x537   :  { %v1518_v8 = vpop.eup %1517 }
 0x538   :  { %v1520_v9 = vpop.eup %1519  ;;  %v1170_v10 = vadd.f32 1.0, %v1518_v8  ;;  %1521 = vpow2.f32 %v1402_v7 }
 0x539   :  { %v1210_v11 = vadd.f32 1.0, %v1520_v9 }
 0x53a   :  { %1523 = vrcp.f32 %v1170_v10  ;;  %v1182_v61 = vand.u32 2147483648, %v1170_v10  ;;  %v1180_v3 = vand.u32 2147483647, %v1170_v10  ;;  %vm1176_vm3 = vweird.f32 %v1170_v10 }
 0x53b   :  { %1525 = vrcp.f32 %v1210_v11  ;;  %v1222_v62 = vand.u32 2147483648, %v1210_v11  ;;  %v1220_v18 = vand.u32 2147483647, %v1210_v11  ;;  %vm1216_vm4 = vweird.f32 %v1210_v11 }
 0x53c   :  { %v1183_v22 = vor.u32 1.1754944e-38, %v1182_v61  ;;  %vm1181_vm7 = vcmp.eq.f32.partialorder %v1180_v3, 8.507059e+37 }
 0x53d   :  { %v1223_v25 = vor.u32 1.1754944e-38, %v1222_v62  ;;  %vm1221_vm8 = vcmp.eq.f32.partialorder %v1220_v18, 8.507059e+37 }
 0x53e   :  { %v1522_v15 = vpop.eup %1521 }
 0x53f   :  { %v1272_v16 = vadd.f32 1.0, %v1522_v15 }
 0x540   :  { %v1524_v17 = vpop.eup %1523 }
 0x541   :  { %v1526_v56 = vpop.eup %1525  ;;  %v1172_v57 = vmul.f32 %v1524_v17, %v1170_v10  ;;  %1527 = vrcp.f32 %v1272_v16  ;;  %vm1177_vm1 = vweird.f32 %v1524_v17  ;;  %v1284_v19 = vand.u32 2147483648, %v1272_v16 }
 0x542   :  { %v1212_v58 = vmul.f32 %v1526_v56, %v1210_v11  ;;  %1529 = vtanh.f32 %v1246_v38  ;;  %vm1217_vm2 = vweird.f32 %v1526_v56  ;;  %vm1178_vm5 = vmor %vm1176_vm3, %vm1177_vm1  ;;  %vm1278_vm10 = vweird.f32 %v1272_v16 }
 0x543   :  { %v1173_v59 = vsub.f32 1.0, %v1172_v57  ;;  %vm1218_vm6 = vmor %vm1216_vm4, %vm1217_vm2  ;;  %v1282_v39 = vand.u32 2147483647, %v1272_v16  ;;  %v1285_v42 = vor.u32 1.1754944e-38, %v1284_v19 }
 0x544   :  { %v1213_v60 = vsub.f32 1.0, %v1212_v58 }
 0x545   :  { %v1174_v63 = vmul.f32 %v1524_v17, %v1173_v59  ;;  %vm1283_vm12 = vcmp.eq.f32.partialorder %v1282_v39, 8.507059e+37 }
 0x546   :  { %v1214_v14 = vmul.f32 %v1526_v56, %v1213_v60 }
 0x547   :  { %v1528_v20 = vpop.eup %1527  ;;  %v1175_v21 = vadd.f32 %v1524_v17, %v1174_v63 }
 0x548   :  { %v1215_v23 = vadd.f32 %v1526_v56, %v1214_v14  ;;  %v1274_v24 = vmul.f32 %v1528_v20, %v1272_v16  ;;  %v1530_v27 = vpop.eup %1529  ;;  %vm1279_vm9 = vweird.f32 %v1528_v20 }
 0x549   :  { %v1179_v26 = vsel %vm1178_vm5, %v1524_v17, %v1175_v21  ;;  %vm1280_vm11 = vmor %vm1278_vm10, %vm1279_vm9 }
 0x54a   :  { %v1184_v28 = vsel %vm1181_vm7, %v1183_v22, %v1179_v26  ;;  %v1219_v30 = vsel %vm1218_vm6, %v1526_v56, %v1215_v23  ;;  %v1275_v31 = vsub.f32 1.0, %v1274_v24 }
 0x54b   :  { %v1224_v32 = vsel %vm1221_vm8, %v1223_v25, %v1219_v30  ;;  %v1289_v33 = vmul.f32 %v1530_v27, %v1184_v28 }
 0x54c   :  { %v1288_v34 = vmul.f32 %v1224_v32, %v1967_v44  ;;  %v1276_v35 = vmul.f32 %v1528_v20, %v1275_v31 }
 0x54e   :  { %v1290_v36 = vadd.f32 %v1289_v33, %v1288_v34  ;;  %v1277_v37 = vadd.f32 %v1528_v20, %v1276_v35 }
 0x550   :  { %1531 = vtanh.f32 %v1290_v36  ;;  %1296 = vst.msk [vmem:[#allocation3] sm:$0x3] %vm15_vm0, %v1290_v36  ;;  %v1281_v40 = vsel %vm1280_vm11, %v1528_v20, %v1277_v37 }
 0x551   :  { %v1286_v45 = vsel %vm1283_vm12, %v1285_v42, %v1281_v40 }
 0x556   :  { %v1532_v43 = vpop.eup %1531 }
 0x557   :  { %v1292_v46 = vmul.f32 %v1532_v43, %v1286_v45 }
 0x559   :  { %1403 = vst.msk [vmem:[%s1999_s2 + $0xe] sm:$0x3] %vm15_vm0, %v1292_v46 }
 0x55a   :  { %1295 = vst.msk [vmem:[#allocation2] sm:$0x3] %vm15_vm0, %v1292_v46 }

</bundles_post_ra>
